<compile_context>
chip_gen: v7x
topology: tpu7x:2x2x1
jax: 0.10.0
libtpu: 0.0.40
codegen_flags: <defaults>
</compile_context>

<pallas_src>
import functools

import jax
import jax.numpy as jnp
from jax.experimental import pallas as pl
from jax.experimental.pallas import tpu as pltpu

# ----------------------------- small synthetic config -----------------------------
VOCAB = 128
HIDDEN = 64
N_HEADS = 4
N_KV_HEADS = 2
HEAD_DIM = 32          # explicit head_dim (Qwen3 style, not hidden // heads)
INTER = 128
N_LAYERS = 2
EPS = 1e-6
ROPE_THETA = 10000.0
SEQ = 16               # total tokens (batch=1, lmdeploy token-major layout)

QKV_OUT = (N_HEADS + 2 * N_KV_HEADS) * HEAD_DIM
GROUP = N_HEADS // N_KV_HEADS


# ------------------------- fused decoder-stack kernel ------------------------------
def decoder_stack_kernel(hidden_in_ref, mask_ref, cos_q_ref, sin_q_ref,
                         cos_k_ref, sin_k_ref,
                         w_qkv_ref, w_o_ref, w_gu_ref, w_down_ref,
                         q_norm_ref, k_norm_ref, in_ln_ref, post_ln_ref,
                         final_ln_ref,
                         out_ref,
                         hidden_s, resid_s, attn_s,
                         *, eps, n_heads, n_kv_heads, head_dim, inter):
    """One grid step == one full Qwen3 decoder layer (carry kept in VMEM)."""
    layer = pl.program_id(0)
    seq = hidden_s.shape[0]
    half = head_dim // 2
    q_base = n_heads * head_dim
    v_base = q_base + n_kv_heads * head_dim

    @pl.when(layer == 0)
    def _init():
        hidden_s[...] = hidden_in_ref[...].astype(jnp.float32)
        resid_s[...] = jnp.zeros_like(resid_s)

    def rms(x, w):                       # x: (R, C) f32, w: (1, C) f32
        var = jnp.mean(x * x, axis=-1, keepdims=True)
        return x * jax.lax.rsqrt(var + eps) * w

    def rope(x, cos, sin):               # rotate-half RoPE on a (R, D) slab, f32
        rot = jnp.concatenate([-x[:, half:], x[:, :half]], axis=-1)
        return x * cos + rot * sin

    # ---- input layernorm (+ residual add) ----
    s = hidden_s[...] + resid_s[...]
    resid_s[...] = s
    h = rms(s, in_ln_ref[...])                                   # (T, HIDDEN) f32

    # ---- qkv projection (bf16 MXU, f32 accumulate) ----
    qkv = jnp.dot(h.astype(jnp.bfloat16), w_qkv_ref[...],
                  preferred_element_type=jnp.float32)            # (T, (H+2KV)*D)

    # ---- stack heads along rows (head-major): q (H*T, D), k/v (KV*T, D) ----
    q_stack = jnp.concatenate(
        [qkv[:, i * head_dim:(i + 1) * head_dim] for i in range(n_heads)], axis=0)
    k_stack = jnp.concatenate(
        [qkv[:, q_base + i * head_dim:q_base + (i + 1) * head_dim]
         for i in range(n_kv_heads)], axis=0)
    v_stack = jnp.concatenate(
        [qkv[:, v_base + i * head_dim:v_base + (i + 1) * head_dim]
         for i in range(n_kv_heads)], axis=0)

    # ---- per-head RMSNorm (1/sqrt(D) folded into q_norm weight) + RoPE ----
    q_stack = rope(rms(q_stack, q_norm_ref[...]), cos_q_ref[...], sin_q_ref[...])
    k_stack = rope(rms(k_stack, k_norm_ref[...]), cos_k_ref[...], sin_k_ref[...])

    # ---- fused causal GQA attention: one score matmul, one softmax, one P@V ----
    sc = jax.lax.dot_general(
        q_stack.astype(jnp.bfloat16), k_stack.astype(jnp.bfloat16),
        (((1,), (1,)), ((), ())),
        preferred_element_type=jnp.float32)                      # (H*T, KV*T) f32
    sc = sc + mask_ref[...]               # additive causal + cross-group mask (f32)
    m = jnp.max(sc, axis=-1, keepdims=True)
    p = jnp.exp(sc - m)
    l = jnp.sum(p, axis=-1, keepdims=True)
    p = p * pl.reciprocal(l, approx=True)
    o_stack = jnp.dot(p.astype(jnp.bfloat16), v_stack.astype(jnp.bfloat16),
                      preferred_element_type=jnp.float32)        # (H*T, D) f32

    # ---- reassemble lane-dense (T, H*D) slab via static-offset scratch stores ----
    for hq in range(n_heads):
        attn_s[:, hq * head_dim:(hq + 1) * head_dim] = o_stack[hq * seq:(hq + 1) * seq, :]

    # ---- o_proj ----
    h = jnp.dot(attn_s[...].astype(jnp.bfloat16), w_o_ref[...],
                preferred_element_type=jnp.float32)              # (T, HIDDEN)

    # ---- post-attention layernorm (+ residual add) ----
    s = h + resid_s[...]
    resid_s[...] = s
    h = rms(s, post_ln_ref[...])

    # ---- MLP: gate_up -> SiluAndMul -> down ----
    gu = jnp.dot(h.astype(jnp.bfloat16), w_gu_ref[...],
                 preferred_element_type=jnp.float32)             # (T, 2*INTER)
    gate = gu[:, :inter]
    up = gu[:, inter:]
    act = gate * jax.nn.sigmoid(gate) * up                       # SiluAndMul, f32
    hidden_s[...] = jnp.dot(act.astype(jnp.bfloat16), w_down_ref[...],
                            preferred_element_type=jnp.float32)  # (T, HIDDEN)

    # ---- final add + RMSNorm, emitted once at the last layer ----
    @pl.when(layer == pl.num_programs(0) - 1)
    def _finalize():
        s_fin = hidden_s[...] + resid_s[...]
        out_ref[...] = rms(s_fin, final_ln_ref[...]).astype(out_ref.dtype)


# ------------------------------ tiled matmul (lm_head) -----------------------------
def matmul_tiled_kernel(a_ref, b_ref, o_ref, acc_ref):
    @pl.when(pl.program_id(2) == 0)
    def _zero():
        acc_ref[...] = jnp.zeros_like(acc_ref)
    acc_ref[...] += jnp.dot(a_ref[...], b_ref[...],
                            preferred_element_type=jnp.float32)
    @pl.when(pl.program_id(2) == pl.num_programs(2) - 1)
    def _store():
        o_ref[...] = acc_ref[...].astype(o_ref.dtype)


def matmul(a, b, *, tm=512, tn=512, tk=512, out_dtype=jnp.float32):
    """a: (M, K), b: (K, N) -> (M, N) out_dtype.  bf16 operands, f32 accumulation."""
    M, K = a.shape
    K2, N = b.shape
    assert K == K2
    # Cast once in the wrapper (halves the A DMA vs f32 and removes the per-step cast).
    a = a.astype(jnp.bfloat16)
    b = b.astype(jnp.bfloat16)
    tm, tn, tk = min(tm, M), min(tn, N), min(tk, K)
    # No tail masking in the kernel -> require exact divisibility (review concern).
    assert M % tm == 0 and N % tn == 0 and K % tk == 0, \
        "matmul: shapes must divide tile sizes (no tail handling)"
    grid = (M // tm, N // tn, K // tk)
    return pl.pallas_call(
        matmul_tiled_kernel,
        grid=grid,
        in_specs=[pl.BlockSpec((tm, tk), lambda i, j, k: (i, k)),
                  pl.BlockSpec((tk, tn), lambda i, j, k: (k, j))],
        out_specs=pl.BlockSpec((tm, tn), lambda i, j, k: (i, j)),
        out_shape=jax.ShapeDtypeStruct((M, N), out_dtype),
        scratch_shapes=[pltpu.VMEM((tm, tn), jnp.float32)],
        compiler_params=pltpu.CompilerParams(
            dimension_semantics=("parallel", "parallel", "arbitrary")),
    )(a, b)


# ----------------------------------- model glue ------------------------------------
def init_params(key):
    def nrm(k, shape, scale=0.02, dtype=jnp.bfloat16):
        return (scale * jax.random.normal(k, shape, dtype=jnp.float32)).astype(dtype)

    keys = jax.random.split(key, 6)
    return {
        # embedding gather happens in JAX; keep the table f32
        'embed': nrm(keys[0], (VOCAB, HIDDEN), dtype=jnp.float32),
        'lm_head': nrm(keys[1], (HIDDEN, VOCAB)),                       # bf16
        'final_norm': jnp.ones((1, HIDDEN), jnp.float32),
        # per-layer weights stacked on a leading layer axis (streamed per grid step)
        'w_qkv': nrm(keys[2], (N_LAYERS, HIDDEN, QKV_OUT)),             # bf16
        'w_o': nrm(keys[3], (N_LAYERS, N_HEADS * HEAD_DIM, HIDDEN)),    # bf16
        'w_gate_up': nrm(keys[4], (N_LAYERS, HIDDEN, 2 * INTER)),       # bf16
        'w_down': nrm(keys[5], (N_LAYERS, INTER, HIDDEN)),              # bf16
        'q_norm': jnp.ones((N_LAYERS, 1, HEAD_DIM), jnp.float32),
        'k_norm': jnp.ones((N_LAYERS, 1, HEAD_DIM), jnp.float32),
        'input_ln': jnp.ones((N_LAYERS, 1, HIDDEN), jnp.float32),
        'post_ln': jnp.ones((N_LAYERS, 1, HIDDEN), jnp.float32),
    }


def rotary_cos_sin(position_ids):
    inv_freq = 1.0 / (ROPE_THETA ** (jnp.arange(0, HEAD_DIM, 2, dtype=jnp.float32)
                                     / HEAD_DIM))
    freqs = position_ids.astype(jnp.float32)[:, None] * inv_freq[None, :]
    emb = jnp.concatenate([freqs, freqs], axis=-1)   # (T, D)
    return jnp.cos(emb), jnp.sin(emb)


def build_attention_mask(seq):
    """Additive mask for the fused (H*T, KV*T) score matrix (causal + GQA block)."""
    rows = jnp.arange(N_HEADS * seq)
    cols = jnp.arange(N_KV_HEADS * seq)
    row_tok, row_head = rows % seq, rows // seq
    col_tok, col_kv = cols % seq, cols // seq
    valid = ((row_head[:, None] // GROUP) == col_kv[None, :]) & \
            (col_tok[None, :] <= row_tok[:, None])
    return jnp.where(valid, 0.0, -1e30).astype(jnp.float32)


def qwen3_forward(params, input_ids, position_ids):
    """Returns final hidden_states, matching Qwen3ForCausalLM.forward."""
    # TODO(synk): embedding gather stays in XLA (jnp.take); a Pallas gather needs
    #             scalar-prefetch/Element plumbing that is not worth it at T=16.
    hidden = jnp.take(params['embed'], input_ids, axis=0)       # (T, HIDDEN) f32
    cos, sin = rotary_cos_sin(position_ids)                     # (T, D) f32 each

    seq, hd = hidden.shape
    n_layers = params['w_qkv'].shape[0]

    # Precomputed (outside the kernel, reused every layer):
    mask_add = build_attention_mask(seq)                        # (H*T, KV*T) f32
    cos_q, sin_q = jnp.tile(cos, (N_HEADS, 1)), jnp.tile(sin, (N_HEADS, 1))
    cos_k, sin_k = jnp.tile(cos, (N_KV_HEADS, 1)), jnp.tile(sin, (N_KV_HEADS, 1))
    # Fold 1/sqrt(head_dim) into the per-head q RMSNorm weight (RoPE is linear).
    q_norm_scaled = params['q_norm'] * jnp.float32(HEAD_DIM ** -0.5)

    kernel = functools.partial(
        decoder_stack_kernel, eps=EPS, n_heads=N_HEADS, n_kv_heads=N_KV_HEADS,
        head_dim=HEAD_DIM, inter=INTER)

    return pl.pallas_call(
        kernel,
        grid=(n_layers,),
        in_specs=[
            pl.BlockSpec((seq, hd), lambda l: (0, 0)),                    # hidden_in
            pl.BlockSpec((N_HEADS * seq, N_KV_HEADS * seq), lambda l: (0, 0)),  # mask
            pl.BlockSpec((N_HEADS * seq, HEAD_DIM), lambda l: (0, 0)),    # cos_q
            pl.BlockSpec((N_HEADS * seq, HEAD_DIM), lambda l: (0, 0)),    # sin_q
            pl.BlockSpec((N_KV_HEADS * seq, HEAD_DIM), lambda l: (0, 0)),  # cos_k
            pl.BlockSpec((N_KV_HEADS * seq, HEAD_DIM), lambda l: (0, 0)),  # sin_k
            # per-layer weights: squeezed layer dim -> kernel sees plain 2-D tiles
            pl.BlockSpec((None, hd, QKV_OUT), lambda l: (l, 0, 0)),        # w_qkv
            pl.BlockSpec((None, N_HEADS * HEAD_DIM, hd), lambda l: (l, 0, 0)),  # w_o
            pl.BlockSpec((None, hd, 2 * INTER), lambda l: (l, 0, 0)),      # w_gate_up
            pl.BlockSpec((None, INTER, hd), lambda l: (l, 0, 0)),          # w_down
            pl.BlockSpec((None, 1, HEAD_DIM), lambda l: (l, 0, 0)),        # q_norm*scale
            pl.BlockSpec((None, 1, HEAD_DIM), lambda l: (l, 0, 0)),        # k_norm
            pl.BlockSpec((None, 1, hd), lambda l: (l, 0, 0)),              # input_ln
            pl.BlockSpec((None, 1, hd), lambda l: (l, 0, 0)),              # post_ln
            pl.BlockSpec((1, hd), lambda l: (0, 0)),                       # final_norm
        ],
        out_specs=pl.BlockSpec((seq, hd), lambda l: (0, 0)),
        out_shape=jax.ShapeDtypeStruct((seq, hd), jnp.float32),
        scratch_shapes=[pltpu.VMEM((seq, hd), jnp.float32),                # hidden carry
                        pltpu.VMEM((seq, hd), jnp.float32),                # residual carry
                        pltpu.VMEM((seq, N_HEADS * HEAD_DIM), jnp.float32)],  # attn slab
        # Layer axis carries state -> must stay sequential ("arbitrary").
        # TODO(synk): on v7x add a parallel query-block axis to occupy the 2nd TC.
        compiler_params=pltpu.CompilerParams(
            dimension_semantics=("arbitrary",)),
    )(hidden, mask_add, cos_q, sin_q, cos_k, sin_k,
      params['w_qkv'], params['w_o'], params['w_gate_up'], params['w_down'],
      q_norm_scaled, params['k_norm'], params['input_ln'], params['post_ln'],
      params['final_norm'])


def get_logits(params, hidden_states):
    return matmul(hidden_states, params['lm_head'])


# -------------------------------------- main ---------------------------------------
if __name__ == "__main__":
    key = jax.random.PRNGKey(0)
    pkey, ikey = jax.random.split(key)
    params = init_params(pkey)

    input_ids = jax.random.randint(ikey, (SEQ,), 0, VOCAB, dtype=jnp.int32)
    position_ids = jnp.arange(SEQ, dtype=jnp.int32)

    fwd = jax.jit(qwen3_forward)
    hidden_states = fwd(params, input_ids, position_ids)
    logits = jax.jit(get_logits)(params, hidden_states)

    jax.block_until_ready(hidden_states)
    jax.block_until_ready(logits)

    assert hidden_states.shape == (SEQ, HIDDEN)
    assert logits.shape == (SEQ, VOCAB)
    assert bool(jnp.isfinite(hidden_states).all())
    assert bool(jnp.isfinite(logits).all())
    print("KERNEL_OK")
</pallas_src>

<mosaic_0001>
module attributes {stable_mosaic.version = 11 : i64} {
  func.func @decoder_stack_kernel(%arg0: i32, %arg1: memref<16x64xf32, #tpu.memory_space<vmem>>, %arg2: memref<64x32xf32, #tpu.memory_space<vmem>>, %arg3: memref<64x32xf32, #tpu.memory_space<vmem>>, %arg4: memref<64x32xf32, #tpu.memory_space<vmem>>, %arg5: memref<32x32xf32, #tpu.memory_space<vmem>>, %arg6: memref<32x32xf32, #tpu.memory_space<vmem>>, %arg7: memref<1x64x256xbf16, #tpu.memory_space<vmem>>, %arg8: memref<1x128x64xbf16, #tpu.memory_space<vmem>>, %arg9: memref<1x64x256xbf16, #tpu.memory_space<vmem>>, %arg10: memref<1x128x64xbf16, #tpu.memory_space<vmem>>, %arg11: memref<1x1x32xf32, #tpu.memory_space<vmem>>, %arg12: memref<1x1x32xf32, #tpu.memory_space<vmem>>, %arg13: memref<1x1x64xf32, #tpu.memory_space<vmem>>, %arg14: memref<1x1x64xf32, #tpu.memory_space<vmem>>, %arg15: memref<1x64xf32, #tpu.memory_space<vmem>>, %arg16: memref<16x64xf32, #tpu.memory_space<vmem>>, %arg17: memref<16x64xf32, #tpu.memory_space<vmem>>, %arg18: memref<16x64xf32, #tpu.memory_space<vmem>>, %arg19: memref<16x128xf32, #tpu.memory_space<vmem>>) attributes {dimension_semantics = [#tpu.dimension_semantics<arbitrary>], iteration_bounds = array<i64: 2>, scalar_prefetch = 0 : i64, scratch_operands = 3 : i64, tpu.core_type = #tpu.core_type<tc>, window_params = [{pipeline_mode = #tpu.pipeline_mode<synchronous>, transform_indices = @transform_0, window_bounds = array<i64: 16, 64>}, {pipeline_mode = #tpu.pipeline_mode<synchronous>, transform_indices = @transform_1, window_bounds = array<i64: 64, 32>}, {pipeline_mode = #tpu.pipeline_mode<synchronous>, transform_indices = @transform_2, window_bounds = array<i64: 64, 32>}, {pipeline_mode = #tpu.pipeline_mode<synchronous>, transform_indices = @transform_3, window_bounds = array<i64: 64, 32>}, {pipeline_mode = #tpu.pipeline_mode<synchronous>, transform_indices = @transform_4, window_bounds = array<i64: 32, 32>}, {pipeline_mode = #tpu.pipeline_mode<synchronous>, transform_indices = @transform_5, window_bounds = array<i64: 32, 32>}, {transform_indices = @transform_6, window_bounds = array<i64: 1, 64, 256>}, {transform_indices = @transform_7, window_bounds = array<i64: 1, 128, 64>}, {transform_indices = @transform_8, window_bounds = array<i64: 1, 64, 256>}, {transform_indices = @transform_9, window_bounds = array<i64: 1, 128, 64>}, {transform_indices = @transform_10, window_bounds = array<i64: 1, 1, 32>}, {transform_indices = @transform_11, window_bounds = array<i64: 1, 1, 32>}, {transform_indices = @transform_12, window_bounds = array<i64: 1, 1, 64>}, {transform_indices = @transform_13, window_bounds = array<i64: 1, 1, 64>}, {pipeline_mode = #tpu.pipeline_mode<synchronous>, transform_indices = @transform_14, window_bounds = array<i64: 1, 64>}, {pipeline_mode = #tpu.pipeline_mode<synchronous>, transform_indices = @transform_15, window_bounds = array<i64: 16, 64>}]} {
    %c0_i32 = arith.constant 0 : i32
    %0 = arith.cmpi eq, %arg0, %c0_i32 : i32
    %1 = arith.extui %0 : i1 to i32
    %c0_i32_0 = arith.constant 0 : i32
    %2 = arith.cmpi ne, %1, %c0_i32_0 : i32
    scf.if %2 {
      %c0_76 = arith.constant 0 : index
      %c0_77 = arith.constant 0 : index
      %153 = vector.load %arg1[%c0_76, %c0_77] : memref<16x64xf32, #tpu.memory_space<vmem>>, vector<16x64xf32>
      %c0_78 = arith.constant 0 : index
      %c0_79 = arith.constant 0 : index
      %154 = vector.load %arg17[%c0_78, %c0_79] : memref<16x64xf32, #tpu.memory_space<vmem>>, vector<16x64xf32>
      tpu.vector_store %arg17[%c0_78, %c0_79], %153 {strides = array<i32>} : memref<16x64xf32, #tpu.memory_space<vmem>>, vector<16x64xf32>,
      %cst_80 = arith.constant 0.000000e+00 : f32
      %155 = vector.broadcast %cst_80 : f32 to vector<16x64xf32>
      %c0_81 = arith.constant 0 : index
      %c0_82 = arith.constant 0 : index
      %156 = vector.load %arg18[%c0_81, %c0_82] : memref<16x64xf32, #tpu.memory_space<vmem>>, vector<16x64xf32>
      tpu.vector_store %arg18[%c0_81, %c0_82], %155 {strides = array<i32>} : memref<16x64xf32, #tpu.memory_space<vmem>>, vector<16x64xf32>,
    } else {
    }
    %c0 = arith.constant 0 : index
    %c0_1 = arith.constant 0 : index
    %3 = vector.load %arg17[%c0, %c0_1] : memref<16x64xf32, #tpu.memory_space<vmem>>, vector<16x64xf32>
    %c0_2 = arith.constant 0 : index
    %c0_3 = arith.constant 0 : index
    %4 = vector.load %arg18[%c0_2, %c0_3] : memref<16x64xf32, #tpu.memory_space<vmem>>, vector<16x64xf32>
    %5 = arith.addf %3, %4 : vector<16x64xf32>
    %c0_4 = arith.constant 0 : index
    %c0_5 = arith.constant 0 : index
    %6 = vector.load %arg18[%c0_4, %c0_5] : memref<16x64xf32, #tpu.memory_space<vmem>>, vector<16x64xf32>
    tpu.vector_store %arg18[%c0_4, %c0_5], %5 {strides = array<i32>} : memref<16x64xf32, #tpu.memory_space<vmem>>, vector<16x64xf32>,
    %c0_6 = arith.constant 0 : index
    %c0_7 = arith.constant 0 : index
    %c0_8 = arith.constant 0 : index
    %7 = vector.load %arg13[%c0_6, %c0_7, %c0_8] : memref<1x1x64xf32, #tpu.memory_space<vmem>>, vector<1x1x64xf32>
    %8 = vector.shape_cast %7 : vector<1x1x64xf32> to vector<1x64xf32>
    %9 = arith.mulf %5, %5 : vector<16x64xf32>
    %cst = arith.constant dense<0.000000e+00> : vector<16xf32>
    %10 = vector.multi_reduction <add>, %9, %cst [1] : vector<16x64xf32> to vector<16xf32>
    %11 = vector.shape_cast %10 : vector<16xf32> to vector<16x1xf32>
    %cst_9 = arith.constant 6.400000e+01 : f32
    %12 = vector.broadcast %cst_9 : f32 to vector<16x1xf32>
    %13 = arith.divf %11, %12 : vector<16x1xf32>
    %cst_10 = arith.constant 9.99999997E-7 : f32
    %14 = vector.broadcast %cst_10 : f32 to vector<16x1xf32>
    %15 = arith.addf %13, %14 : vector<16x1xf32>
    %16 = math.rsqrt %15 : vector<16x1xf32>
    %17 = vector.broadcast %16 : vector<16x1xf32> to vector<16x64xf32>
    %18 = arith.mulf %5, %17 : vector<16x64xf32>
    %19 = vector.broadcast %8 : vector<1x64xf32> to vector<16x64xf32>
    %20 = arith.mulf %18, %19 : vector<16x64xf32>
    %21 = arith.truncf %20 : vector<16x64xf32> to vector<16x64xbf16>
    %c0_11 = arith.constant 0 : index
    %c0_12 = arith.constant 0 : index
    %c0_13 = arith.constant 0 : index
    %22 = vector.load %arg7[%c0_11, %c0_12, %c0_13] : memref<1x64x256xbf16, #tpu.memory_space<vmem>>, vector<1x64x256xbf16>
    %23 = vector.shape_cast %22 : vector<1x64x256xbf16> to vector<64x256xbf16>
    %cst_14 = arith.constant dense<0.000000e+00> : vector<16x256xf32>
    %24 = tpu.matmul %21, %23, %cst_14 {dimension_numbers = #tpu.dot_dimension_numbers<[1], [0], [0], [1], [0, 0, 1, 1], [], []>} : vector<16x64xbf16>, vector<64x256xbf16>, vector<16x256xf32> -> vector<16x256xf32>
    %25 = vector.extract_strided_slice %24 {offsets = [0, 0], sizes = [16, 32], strides = [1, 1]} : vector<16x256xf32> to vector<16x32xf32>
    %26 = vector.extract_strided_slice %24 {offsets = [0, 32], sizes = [16, 32], strides = [1, 1]} : vector<16x256xf32> to vector<16x32xf32>
    %27 = vector.extract_strided_slice %24 {offsets = [0, 64], sizes = [16, 32], strides = [1, 1]} : vector<16x256xf32> to vector<16x32xf32>
    %28 = vector.extract_strided_slice %24 {offsets = [0, 96], sizes = [16, 32], strides = [1, 1]} : vector<16x256xf32> to vector<16x32xf32>
    %29 = tpu.concatenate %25, %26, %27, %28 in 0 : vector<16x32xf32>, vector<16x32xf32>, vector<16x32xf32>, vector<16x32xf32> -> vector<64x32xf32>
    %30 = vector.extract_strided_slice %24 {offsets = [0, 128], sizes = [16, 32], strides = [1, 1]} : vector<16x256xf32> to vector<16x32xf32>
    %31 = vector.extract_strided_slice %24 {offsets = [0, 160], sizes = [16, 32], strides = [1, 1]} : vector<16x256xf32> to vector<16x32xf32>
    %32 = tpu.concatenate %30, %31 in 0 : vector<16x32xf32>, vector<16x32xf32> -> vector<32x32xf32>
    %33 = vector.extract_strided_slice %24 {offsets = [0, 192], sizes = [16, 32], strides = [1, 1]} : vector<16x256xf32> to vector<16x32xf32>
    %34 = vector.extract_strided_slice %24 {offsets = [0, 224], sizes = [16, 32], strides = [1, 1]} : vector<16x256xf32> to vector<16x32xf32>
    %35 = tpu.concatenate %33, %34 in 0 : vector<16x32xf32>, vector<16x32xf32> -> vector<32x32xf32>
    %c0_15 = arith.constant 0 : index
    %c0_16 = arith.constant 0 : index
    %c0_17 = arith.constant 0 : index
    %36 = vector.load %arg11[%c0_15, %c0_16, %c0_17] : memref<1x1x32xf32, #tpu.memory_space<vmem>>, vector<1x1x32xf32>
    %37 = vector.shape_cast %36 : vector<1x1x32xf32> to vector<1x32xf32>
    %38 = arith.mulf %29, %29 : vector<64x32xf32>
    %cst_18 = arith.constant dense<0.000000e+00> : vector<64xf32>
    %39 = vector.multi_reduction <add>, %38, %cst_18 [1] : vector<64x32xf32> to vector<64xf32>
    %40 = vector.shape_cast %39 : vector<64xf32> to vector<64x1xf32>
    %cst_19 = arith.constant 3.200000e+01 : f32
    %41 = vector.broadcast %cst_19 : f32 to vector<64x1xf32>
    %42 = arith.divf %40, %41 : vector<64x1xf32>
    %cst_20 = arith.constant 9.99999997E-7 : f32
    %43 = vector.broadcast %cst_20 : f32 to vector<64x1xf32>
    %44 = arith.addf %42, %43 : vector<64x1xf32>
    %45 = math.rsqrt %44 : vector<64x1xf32>
    %46 = vector.broadcast %45 : vector<64x1xf32> to vector<64x32xf32>
    %47 = arith.mulf %29, %46 : vector<64x32xf32>
    %48 = vector.broadcast %37 : vector<1x32xf32> to vector<64x32xf32>
    %49 = arith.mulf %47, %48 : vector<64x32xf32>
    %c0_21 = arith.constant 0 : index
    %c0_22 = arith.constant 0 : index
    %50 = vector.load %arg3[%c0_21, %c0_22] : memref<64x32xf32, #tpu.memory_space<vmem>>, vector<64x32xf32>
    %c0_23 = arith.constant 0 : index
    %c0_24 = arith.constant 0 : index
    %51 = vector.load %arg4[%c0_23, %c0_24] : memref<64x32xf32, #tpu.memory_space<vmem>>, vector<64x32xf32>
    %52 = vector.extract_strided_slice %49 {offsets = [0, 16], sizes = [64, 16], strides = [1, 1]} : vector<64x32xf32> to vector<64x16xf32>
    %cst_25 = arith.constant 0.000000e+00 : f32
    %53 = vector.broadcast %cst_25 : f32 to vector<64x16xf32>
    %54 = arith.subf %53, %52 : vector<64x16xf32>
    %55 = vector.extract_strided_slice %49 {offsets = [0, 0], sizes = [64, 16], strides = [1, 1]} : vector<64x32xf32> to vector<64x16xf32>
    %56 = tpu.concatenate %54, %55 in 1 : vector<64x16xf32>, vector<64x16xf32> -> vector<64x32xf32>
    %57 = arith.mulf %49, %50 : vector<64x32xf32>
    %58 = arith.mulf %56, %51 : vector<64x32xf32>
    %59 = arith.addf %57, %58 : vector<64x32xf32>
    %c0_26 = arith.constant 0 : index
    %c0_27 = arith.constant 0 : index
    %c0_28 = arith.constant 0 : index
    %60 = vector.load %arg12[%c0_26, %c0_27, %c0_28] : memref<1x1x32xf32, #tpu.memory_space<vmem>>, vector<1x1x32xf32>
    %61 = vector.shape_cast %60 : vector<1x1x32xf32> to vector<1x32xf32>
    %62 = arith.mulf %32, %32 : vector<32x32xf32>
    %cst_29 = arith.constant dense<0.000000e+00> : vector<32xf32>
    %63 = vector.multi_reduction <add>, %62, %cst_29 [1] : vector<32x32xf32> to vector<32xf32>
    %64 = vector.shape_cast %63 : vector<32xf32> to vector<32x1xf32>
    %cst_30 = arith.constant 3.200000e+01 : f32
    %65 = vector.broadcast %cst_30 : f32 to vector<32x1xf32>
    %66 = arith.divf %64, %65 : vector<32x1xf32>
    %cst_31 = arith.constant 9.99999997E-7 : f32
    %67 = vector.broadcast %cst_31 : f32 to vector<32x1xf32>
    %68 = arith.addf %66, %67 : vector<32x1xf32>
    %69 = math.rsqrt %68 : vector<32x1xf32>
    %70 = vector.broadcast %69 : vector<32x1xf32> to vector<32x32xf32>
    %71 = arith.mulf %32, %70 : vector<32x32xf32>
    %72 = vector.broadcast %61 : vector<1x32xf32> to vector<32x32xf32>
    %73 = arith.mulf %71, %72 : vector<32x32xf32>
    %c0_32 = arith.constant 0 : index
    %c0_33 = arith.constant 0 : index
    %74 = vector.load %arg5[%c0_32, %c0_33] : memref<32x32xf32, #tpu.memory_space<vmem>>, vector<32x32xf32>
    %c0_34 = arith.constant 0 : index
    %c0_35 = arith.constant 0 : index
    %75 = vector.load %arg6[%c0_34, %c0_35] : memref<32x32xf32, #tpu.memory_space<vmem>>, vector<32x32xf32>
    %76 = vector.extract_strided_slice %73 {offsets = [0, 16], sizes = [32, 16], strides = [1, 1]} : vector<32x32xf32> to vector<32x16xf32>
    %cst_36 = arith.constant 0.000000e+00 : f32
    %77 = vector.broadcast %cst_36 : f32 to vector<32x16xf32>
    %78 = arith.subf %77, %76 : vector<32x16xf32>
    %79 = vector.extract_strided_slice %73 {offsets = [0, 0], sizes = [32, 16], strides = [1, 1]} : vector<32x32xf32> to vector<32x16xf32>
    %80 = tpu.concatenate %78, %79 in 1 : vector<32x16xf32>, vector<32x16xf32> -> vector<32x32xf32>
    %81 = arith.mulf %73, %74 : vector<32x32xf32>
    %82 = arith.mulf %80, %75 : vector<32x32xf32>
    %83 = arith.addf %81, %82 : vector<32x32xf32>
    %84 = arith.truncf %59 : vector<64x32xf32> to vector<64x32xbf16>
    %85 = arith.truncf %83 : vector<32x32xf32> to vector<32x32xbf16>
    %cst_37 = arith.constant dense<0.000000e+00> : vector<64x32xf32>
    %86 = tpu.matmul %84, %85, %cst_37 {dimension_numbers = #tpu.dot_dimension_numbers<[1], [1], [0], [0], [0, 0, 1, 0], [], []>} : vector<64x32xbf16>, vector<32x32xbf16>, vector<64x32xf32> -> vector<64x32xf32>
    %c0_38 = arith.constant 0 : index
    %c0_39 = arith.constant 0 : index
    %87 = vector.load %arg2[%c0_38, %c0_39] : memref<64x32xf32, #tpu.memory_space<vmem>>, vector<64x32xf32>
    %88 = arith.addf %86, %87 : vector<64x32xf32>
    %cst_40 = arith.constant dense<0xFF800000> : vector<64xf32>
    %89 = vector.multi_reduction <maximumf>, %88, %cst_40 [1] : vector<64x32xf32> to vector<64xf32>
    %90 = vector.shape_cast %89 : vector<64xf32> to vector<64x1xf32>
    %91 = vector.broadcast %90 : vector<64x1xf32> to vector<64x32xf32>
    %92 = arith.subf %88, %91 : vector<64x32xf32>
    %93 = math.exp %92 : vector<64x32xf32>
    %cst_41 = arith.constant dense<0.000000e+00> : vector<64xf32>
    %94 = vector.multi_reduction <add>, %93, %cst_41 [1] : vector<64x32xf32> to vector<64xf32>
    %95 = vector.shape_cast %94 : vector<64xf32> to vector<64x1xf32>
    %96 = tpu.reciprocal %95 {approx = true} : vector<64x1xf32> -> vector<64x1xf32>
    %97 = vector.broadcast %96 : vector<64x1xf32> to vector<64x32xf32>
    %98 = arith.mulf %93, %97 : vector<64x32xf32>
    %99 = arith.truncf %98 : vector<64x32xf32> to vector<64x32xbf16>
    %100 = arith.truncf %35 : vector<32x32xf32> to vector<32x32xbf16>
    %cst_42 = arith.constant dense<0.000000e+00> : vector<64x32xf32>
    %101 = tpu.matmul %99, %100, %cst_42 {dimension_numbers = #tpu.dot_dimension_numbers<[1], [0], [0], [1], [0, 0, 1, 1], [], []>} : vector<64x32xbf16>, vector<32x32xbf16>, vector<64x32xf32> -> vector<64x32xf32>
    %102 = vector.extract_strided_slice %101 {offsets = [0, 0], sizes = [16, 32], strides = [1, 1]} : vector<64x32xf32> to vector<16x32xf32>
    %c0_43 = arith.constant 0 : index
    %c0_44 = arith.constant 0 : index
    %103 = vector.load %arg19[%c0_43, %c0_44] : memref<16x128xf32, #tpu.memory_space<vmem>>, vector<16x32xf32>
    tpu.vector_store %arg19[%c0_43, %c0_44], %102 {strides = array<i32>} : memref<16x128xf32, #tpu.memory_space<vmem>>, vector<16x32xf32>,
    %104 = vector.extract_strided_slice %101 {offsets = [16, 0], sizes = [16, 32], strides = [1, 1]} : vector<64x32xf32> to vector<16x32xf32>
    %c0_45 = arith.constant 0 : index
    %c32 = arith.constant 32 : index
    %105 = vector.load %arg19[%c0_45, %c32] : memref<16x128xf32, #tpu.memory_space<vmem>>, vector<16x32xf32>
    tpu.vector_store %arg19[%c0_45, %c32], %104 {strides = array<i32>} : memref<16x128xf32, #tpu.memory_space<vmem>>, vector<16x32xf32>,
    %106 = vector.extract_strided_slice %101 {offsets = [32, 0], sizes = [16, 32], strides = [1, 1]} : vector<64x32xf32> to vector<16x32xf32>
    %c0_46 = arith.constant 0 : index
    %c64 = arith.constant 64 : index
    %107 = vector.load %arg19[%c0_46, %c64] : memref<16x128xf32, #tpu.memory_space<vmem>>, vector<16x32xf32>
    tpu.vector_store %arg19[%c0_46, %c64], %106 {strides = array<i32>} : memref<16x128xf32, #tpu.memory_space<vmem>>, vector<16x32xf32>,
    %108 = vector.extract_strided_slice %101 {offsets = [48, 0], sizes = [16, 32], strides = [1, 1]} : vector<64x32xf32> to vector<16x32xf32>
    %c0_47 = arith.constant 0 : index
    %c96 = arith.constant 96 : index
    %109 = vector.load %arg19[%c0_47, %c96] : memref<16x128xf32, #tpu.memory_space<vmem>>, vector<16x32xf32>
    tpu.vector_store %arg19[%c0_47, %c96], %108 {strides = array<i32>} : memref<16x128xf32, #tpu.memory_space<vmem>>, vector<16x32xf32>,
    %c0_48 = arith.constant 0 : index
    %c0_49 = arith.constant 0 : index
    %110 = vector.load %arg19[%c0_48, %c0_49] : memref<16x128xf32, #tpu.memory_space<vmem>>, vector<16x128xf32>
    %111 = arith.truncf %110 : vector<16x128xf32> to vector<16x128xbf16>
    %c0_50 = arith.constant 0 : index
    %c0_51 = arith.constant 0 : index
    %c0_52 = arith.constant 0 : index
    %112 = vector.load %arg8[%c0_50, %c0_51, %c0_52] : memref<1x128x64xbf16, #tpu.memory_space<vmem>>, vector<1x128x64xbf16>
    %113 = vector.shape_cast %112 : vector<1x128x64xbf16> to vector<128x64xbf16>
    %cst_53 = arith.constant dense<0.000000e+00> : vector<16x64xf32>
    %114 = tpu.matmul %111, %113, %cst_53 {dimension_numbers = #tpu.dot_dimension_numbers<[1], [0], [0], [1], [0, 0, 1, 1], [], []>} : vector<16x128xbf16>, vector<128x64xbf16>, vector<16x64xf32> -> vector<16x64xf32>
    %c0_54 = arith.constant 0 : index
    %c0_55 = arith.constant 0 : index
    %115 = vector.load %arg18[%c0_54, %c0_55] : memref<16x64xf32, #tpu.memory_space<vmem>>, vector<16x64xf32>
    %116 = arith.addf %114, %115 : vector<16x64xf32>
    %c0_56 = arith.constant 0 : index
    %c0_57 = arith.constant 0 : index
    %117 = vector.load %arg18[%c0_56, %c0_57] : memref<16x64xf32, #tpu.memory_space<vmem>>, vector<16x64xf32>
    tpu.vector_store %arg18[%c0_56, %c0_57], %116 {strides = array<i32>} : memref<16x64xf32, #tpu.memory_space<vmem>>, vector<16x64xf32>,
    %c0_58 = arith.constant 0 : index
    %c0_59 = arith.constant 0 : index
    %c0_60 = arith.constant 0 : index
    %118 = vector.load %arg14[%c0_58, %c0_59, %c0_60] : memref<1x1x64xf32, #tpu.memory_space<vmem>>, vector<1x1x64xf32>
    %119 = vector.shape_cast %118 : vector<1x1x64xf32> to vector<1x64xf32>
    %120 = arith.mulf %116, %116 : vector<16x64xf32>
    %cst_61 = arith.constant dense<0.000000e+00> : vector<16xf32>
    %121 = vector.multi_reduction <add>, %120, %cst_61 [1] : vector<16x64xf32> to vector<16xf32>
    %122 = vector.shape_cast %121 : vector<16xf32> to vector<16x1xf32>
    %cst_62 = arith.constant 6.400000e+01 : f32
    %123 = vector.broadcast %cst_62 : f32 to vector<16x1xf32>
    %124 = arith.divf %122, %123 : vector<16x1xf32>
    %cst_63 = arith.constant 9.99999997E-7 : f32
    %125 = vector.broadcast %cst_63 : f32 to vector<16x1xf32>
    %126 = arith.addf %124, %125 : vector<16x1xf32>
    %127 = math.rsqrt %126 : vector<16x1xf32>
    %128 = vector.broadcast %127 : vector<16x1xf32> to vector<16x64xf32>
    %129 = arith.mulf %116, %128 : vector<16x64xf32>
    %130 = vector.broadcast %119 : vector<1x64xf32> to vector<16x64xf32>
    %131 = arith.mulf %129, %130 : vector<16x64xf32>
    %132 = arith.truncf %131 : vector<16x64xf32> to vector<16x64xbf16>
    %c0_64 = arith.constant 0 : index
    %c0_65 = arith.constant 0 : index
    %c0_66 = arith.constant 0 : index
    %133 = vector.load %arg9[%c0_64, %c0_65, %c0_66] : memref<1x64x256xbf16, #tpu.memory_space<vmem>>, vector<1x64x256xbf16>
    %134 = vector.shape_cast %133 : vector<1x64x256xbf16> to vector<64x256xbf16>
    %cst_67 = arith.constant dense<0.000000e+00> : vector<16x256xf32>
    %135 = tpu.matmul %132, %134, %cst_67 {dimension_numbers = #tpu.dot_dimension_numbers<[1], [0], [0], [1], [0, 0, 1, 1], [], []>} : vector<16x64xbf16>, vector<64x256xbf16>, vector<16x256xf32> -> vector<16x256xf32>
    %136 = vector.extract_strided_slice %135 {offsets = [0, 0], sizes = [16, 128], strides = [1, 1]} : vector<16x256xf32> to vector<16x128xf32>
    %137 = vector.extract_strided_slice %135 {offsets = [0, 128], sizes = [16, 128], strides = [1, 1]} : vector<16x256xf32> to vector<16x128xf32>
    %138 = arith.negf %136 : vector<16x128xf32>
    %139 = math.exp %138 : vector<16x128xf32>
    %cst_68 = arith.constant 1.000000e+00 : f32
    %140 = vector.broadcast %cst_68 : f32 to vector<16x128xf32>
    %141 = arith.addf %140, %139 : vector<16x128xf32>
    %142 = arith.divf %140, %141 : vector<16x128xf32>
    %143 = arith.mulf %136, %142 : vector<16x128xf32>
    %144 = arith.mulf %143, %137 : vector<16x128xf32>
    %145 = arith.truncf %144 : vector<16x128xf32> to vector<16x128xbf16>
    %c0_69 = arith.constant 0 : index
    %c0_70 = arith.constant 0 : index
    %c0_71 = arith.constant 0 : index
    %146 = vector.load %arg10[%c0_69, %c0_70, %c0_71] : memref<1x128x64xbf16, #tpu.memory_space<vmem>>, vector<1x128x64xbf16>
    %147 = vector.shape_cast %146 : vector<1x128x64xbf16> to vector<128x64xbf16>
    %cst_72 = arith.constant dense<0.000000e+00> : vector<16x64xf32>
    %148 = tpu.matmul %145, %147, %cst_72 {dimension_numbers = #tpu.dot_dimension_numbers<[1], [0], [0], [1], [0, 0, 1, 1], [], []>} : vector<16x128xbf16>, vector<128x64xbf16>, vector<16x64xf32> -> vector<16x64xf32>
    %c0_73 = arith.constant 0 : index
    %c0_74 = arith.constant 0 : index
    %149 = vector.load %arg17[%c0_73, %c0_74] : memref<16x64xf32, #tpu.memory_space<vmem>>, vector<16x64xf32>
    tpu.vector_store %arg17[%c0_73, %c0_74], %148 {strides = array<i32>} : memref<16x64xf32, #tpu.memory_space<vmem>>, vector<16x64xf32>,
    %c1_i32 = arith.constant 1 : i32
    %150 = arith.cmpi eq, %arg0, %c1_i32 : i32
    %151 = arith.extui %150 : i1 to i32
    %c0_i32_75 = arith.constant 0 : i32
    %152 = arith.cmpi ne, %151, %c0_i32_75 : i32
    scf.if %152 {
      %c0_76 = arith.constant 0 : index
      %c0_77 = arith.constant 0 : index
      %153 = vector.load %arg17[%c0_76, %c0_77] : memref<16x64xf32, #tpu.memory_space<vmem>>, vector<16x64xf32>
      %c0_78 = arith.constant 0 : index
      %c0_79 = arith.constant 0 : index
      %154 = vector.load %arg18[%c0_78, %c0_79] : memref<16x64xf32, #tpu.memory_space<vmem>>, vector<16x64xf32>
      %155 = arith.addf %153, %154 : vector<16x64xf32>
      %c0_80 = arith.constant 0 : index
      %c0_81 = arith.constant 0 : index
      %156 = vector.load %arg15[%c0_80, %c0_81] : memref<1x64xf32, #tpu.memory_space<vmem>>, vector<1x64xf32>
      %157 = arith.mulf %155, %155 : vector<16x64xf32>
      %cst_82 = arith.constant dense<0.000000e+00> : vector<16xf32>
      %158 = vector.multi_reduction <add>, %157, %cst_82 [1] : vector<16x64xf32> to vector<16xf32>
      %159 = vector.shape_cast %158 : vector<16xf32> to vector<16x1xf32>
      %cst_83 = arith.constant 6.400000e+01 : f32
      %160 = vector.broadcast %cst_83 : f32 to vector<16x1xf32>
      %161 = arith.divf %159, %160 : vector<16x1xf32>
      %cst_84 = arith.constant 9.99999997E-7 : f32
      %162 = vector.broadcast %cst_84 : f32 to vector<16x1xf32>
      %163 = arith.addf %161, %162 : vector<16x1xf32>
      %164 = math.rsqrt %163 : vector<16x1xf32>
      %165 = vector.broadcast %164 : vector<16x1xf32> to vector<16x64xf32>
      %166 = arith.mulf %155, %165 : vector<16x64xf32>
      %167 = vector.broadcast %156 : vector<1x64xf32> to vector<16x64xf32>
      %168 = arith.mulf %166, %167 : vector<16x64xf32>
      %c0_85 = arith.constant 0 : index
      %c0_86 = arith.constant 0 : index
      %169 = vector.load %arg16[%c0_85, %c0_86] : memref<16x64xf32, #tpu.memory_space<vmem>>, vector<16x64xf32>
      tpu.vector_store %arg16[%c0_85, %c0_86], %168 {strides = array<i32>} : memref<16x64xf32, #tpu.memory_space<vmem>>, vector<16x64xf32>,
    } else {
    }
    return
  }
  func.func @transform_0(%arg0: i32) -> (i32, i32) {
    %c0_i32 = arith.constant 0 : i32
    %c0_i32_0 = arith.constant 0 : i32
    %c0_i32_1 = arith.constant 0 : i32
    return %c0_i32, %c0_i32_0 : i32, i32
  }
  func.func @transform_1(%arg0: i32) -> (i32, i32) {
    %c0_i32 = arith.constant 0 : i32
    %c0_i32_0 = arith.constant 0 : i32
    %c0_i32_1 = arith.constant 0 : i32
    return %c0_i32, %c0_i32_0 : i32, i32
  }
  func.func @transform_2(%arg0: i32) -> (i32, i32) {
    %c0_i32 = arith.constant 0 : i32
    %c0_i32_0 = arith.constant 0 : i32
    %c0_i32_1 = arith.constant 0 : i32
    return %c0_i32, %c0_i32_0 : i32, i32
  }
  func.func @transform_3(%arg0: i32) -> (i32, i32) {
    %c0_i32 = arith.constant 0 : i32
    %c0_i32_0 = arith.constant 0 : i32
    %c0_i32_1 = arith.constant 0 : i32
    return %c0_i32, %c0_i32_0 : i32, i32
  }
  func.func @transform_4(%arg0: i32) -> (i32, i32) {
    %c0_i32 = arith.constant 0 : i32
    %c0_i32_0 = arith.constant 0 : i32
    %c0_i32_1 = arith.constant 0 : i32
    return %c0_i32, %c0_i32_0 : i32, i32
  }
  func.func @transform_5(%arg0: i32) -> (i32, i32) {
    %c0_i32 = arith.constant 0 : i32
    %c0_i32_0 = arith.constant 0 : i32
    %c0_i32_1 = arith.constant 0 : i32
    return %c0_i32, %c0_i32_0 : i32, i32
  }
  func.func @transform_6(%arg0: i32) -> (i32, i32, i32) {
    %c0_i32 = arith.constant 0 : i32
    %c0_i32_0 = arith.constant 0 : i32
    %c0_i32_1 = arith.constant 0 : i32
    return %arg0, %c0_i32, %c0_i32_0 : i32, i32, i32
  }
  func.func @transform_7(%arg0: i32) -> (i32, i32, i32) {
    %c0_i32 = arith.constant 0 : i32
    %c0_i32_0 = arith.constant 0 : i32
    %c0_i32_1 = arith.constant 0 : i32
    return %arg0, %c0_i32, %c0_i32_0 : i32, i32, i32
  }
  func.func @transform_8(%arg0: i32) -> (i32, i32, i32) {
    %c0_i32 = arith.constant 0 : i32
    %c0_i32_0 = arith.constant 0 : i32
    %c0_i32_1 = arith.constant 0 : i32
    return %arg0, %c0_i32, %c0_i32_0 : i32, i32, i32
  }
  func.func @transform_9(%arg0: i32) -> (i32, i32, i32) {
    %c0_i32 = arith.constant 0 : i32
    %c0_i32_0 = arith.constant 0 : i32
    %c0_i32_1 = arith.constant 0 : i32
    return %arg0, %c0_i32, %c0_i32_0 : i32, i32, i32
  }
  func.func @transform_10(%arg0: i32) -> (i32, i32, i32) {
    %c0_i32 = arith.constant 0 : i32
    %c0_i32_0 = arith.constant 0 : i32
    %c0_i32_1 = arith.constant 0 : i32
    return %arg0, %c0_i32, %c0_i32_0 : i32, i32, i32
  }
  func.func @transform_11(%arg0: i32) -> (i32, i32, i32) {
    %c0_i32 = arith.constant 0 : i32
    %c0_i32_0 = arith.constant 0 : i32
    %c0_i32_1 = arith.constant 0 : i32
    return %arg0, %c0_i32, %c0_i32_0 : i32, i32, i32
  }
  func.func @transform_12(%arg0: i32) -> (i32, i32, i32) {
    %c0_i32 = arith.constant 0 : i32
    %c0_i32_0 = arith.constant 0 : i32
    %c0_i32_1 = arith.constant 0 : i32
    return %arg0, %c0_i32, %c0_i32_0 : i32, i32, i32
  }
  func.func @transform_13(%arg0: i32) -> (i32, i32, i32) {
    %c0_i32 = arith.constant 0 : i32
    %c0_i32_0 = arith.constant 0 : i32
    %c0_i32_1 = arith.constant 0 : i32
    return %arg0, %c0_i32, %c0_i32_0 : i32, i32, i32
  }
  func.func @transform_14(%arg0: i32) -> (i32, i32) {
    %c0_i32 = arith.constant 0 : i32
    %c0_i32_0 = arith.constant 0 : i32
    %c0_i32_1 = arith.constant 0 : i32
    return %c0_i32, %c0_i32_0 : i32, i32
  }
  func.func @transform_15(%arg0: i32) -> (i32, i32) {
    %c0_i32 = arith.constant 0 : i32
    %c0_i32_0 = arith.constant 0 : i32
    %c0_i32_1 = arith.constant 0 : i32
    return %c0_i32, %c0_i32_0 : i32, i32
  }
}

</mosaic_0001>

<bundles_post_ra>
// kernel: qwen3_forward.1
= control target key start
LH: loop header
LB: loop body
LE: loop exit
PB: predicated region body
PF: predicated region fallthrough
CT: control target
= control target key end

     0   :  { %s2848_s0 = inlined_call_operand.vmem [shape: f32[16,64], index: 0, kind: input, shape index: {}]   ;;  %s2849_s1 = inlined_call_operand.vmem [shape: f32[64,32], index: 1, kind: input, shape index: {}]   ;;  %s2850_s2 = inlined_call_operand.vmem [shape: f32[64,32], index: 2, kind: input, shape index: {}]   ;;  %s2851_s3 = inlined_call_operand.vmem [shape: f32[64,32], index: 3, kind: input, shape index: {}]   ;;  %s2852_s4 = inlined_call_operand.vmem [shape: f32[32,32], index: 4, kind: input, shape index: {}]   ;;  %s2853_s5 = inlined_call_operand.vmem [shape: f32[32,32], index: 5, kind: input, shape index: {}]   ;;  %s2854_s6 = inlined_call_operand.vmem [shape: bf16[2,64,256], index: 6, kind: input, shape index: {}]   ;;  %s2855_s7 = inlined_call_operand.vmem [shape: bf16[2,128,64], index: 7, kind: input, shape index: {}]   ;;  %s2856_s8 = inlined_call_operand.vmem [shape: bf16[2,64,256], index: 8, kind: input, shape index: {}]   ;;  %s2857_s9 = inlined_call_operand.vmem [shape: bf16[2,128,64], index: 9, kind: input, shape index: {}]   ;;  %s2858_s10 = inlined_call_operand.vmem [shape: f32[2,1,32], index: 10, kind: input, shape index: {}]   ;;  %s2859_s11 = inlined_call_operand.vmem [shape: f32[2,1,32], index: 11, kind: input, shape index: {}]   ;;  %s2860_s12 = inlined_call_operand.vmem [shape: f32[2,1,64], index: 12, kind: input, shape index: {}]   ;;  %s2861_s13 = inlined_call_operand.vmem [shape: f32[2,1,64], index: 13, kind: input, shape index: {}]   ;;  %s2862_s14 = inlined_call_operand.vmem [shape: f32[1,64], index: 14, kind: input, shape index: {}]   ;;  %s2863_s15 = inlined_call_operand.hbm [shape: f32[16,64], index: 15, kind: output, shape index: {}]  }
   0x1   :  { %2867 = sst [smem:[#allocation10_spill]] %s2854_s6 }
   0x2   :  { %2868 = sst [smem:[#allocation11_spill]] %s2855_s7 }
   0x3   :  { %2869 = sst [smem:[#allocation12_spill]] %s2862_s14 }
   0x4   :  { %2870 = sst [smem:[#allocation13_spill]] %s2863_s15 }
   0x5   :  { %20 = vsyncpa [#allocation6], 0  ;;  %s2335_s18 = smov 0  }
   0x6 LB: > { %2871 = sst [smem:[#allocation8_spill]] %s2241_s18  ;;  %s2341_s19 = sadd.s32 4294967295, %s2241_s18   ;;  %s2241_s18 = sphi %s2335_s18, %s26_s18  }
   0x7   : > { %p1899_p0 = scmp.ge.s32.totalorder %s2241_s18, 1  ;;  %p495_p1 = scmp.lt.s32.totalorder %s2241_s18, 3 }
   0x9   : > { %p496_p2 = pnand %p1899_p0, %p495_p1 }
   0xb   : > { %499 = sbr.rel (%p496_p2) target bundleno = 2815 (0xaff), region = 80 }
  0x12   : > { %p565_p3 = scmp.lt.s32.totalorder %s2341_s19, 1  ;;  %s2872_s6 = sld [smem:[#allocation10_spill]] }
  0x13   : > { %s2873_s7 = sld [smem:[#allocation11_spill]]  ;;  %p1908_p4 = scmp.ne.s32.totalorder %s2341_s19, 0 }
  0x14   : > { %s2347_s20 = scalar_select %p565_p3, %s2341_s19, 1 }
  0x15   : > { %601 = sbr.rel (%p1908_p4) target bundleno = 28 (0x1c), region = 84  ;;  %v602_v0 = vld [vmem:[%s2848_s0] sm:$0xff] (!%p1908_p4)  ;;  %vm604_vm0 = vcmask (!%p1908_p4), 523264   ;;  %v603_v1 = vld [vmem:[%s2848_s0 + $0x8] sm:$0xff] (!%p1908_p4)  ;;  %v2243_v2 = vmov (!%p1908_p4), 0.0  }
  0x16   : > { %s1963_s21 = sshll.u32 %s2347_s20, 6  ;;  %s590_s25 = scalar_lea.vmem %s2859_s11, %s2347_s20  ;;  %605 = vst.msk [vmem:[#allocation2] sm:$0xff] (!%p1908_p4), %vm604_vm0, %v602_v0  ;;  %606 = vst.msk [vmem:[#allocation2 + $0x8] sm:$0xff] (!%p1908_p4), %vm604_vm0, %v603_v1 }
  0x17   : > { %s2367_s18 = scalar_lea.vmem %s2856_s8, %s1963_s21  ;;  %s2372_s22 = scalar_lea.vmem %s2857_s9, %s1963_s21  ;;  %607 = vst.msk [vmem:[#allocation3] sm:$0xff] (!%p1908_p4), %vm604_vm0, %v2243_v2  ;;  %608 = vst.msk [vmem:[#allocation3 + $0x8] sm:$0xff] (!%p1908_p4), %vm604_vm0, %v2243_v2 }
  0x18   : > { %s2357_s27 = scalar_lea.vmem %s2872_s6, %s1963_s21  ;;  %s593_s28 = scalar_lea.vmem %s2860_s12, %s2347_s20 }
  0x19   : > { %s2362_s30 = scalar_lea.vmem %s2873_s7, %s1963_s21 }
  0x1a   : > { %2874 = sst [smem:[#allocation9_spill]] %s2362_s30  ;;  %s596_s30 = scalar_lea.vmem %s2861_s13, %s2347_s20 }
  0x1c PF: > { %vm615_vm1 = vcmask 523264   ;;  %v2089_v13 = vld [vmem:[%s2357_s27 + $0x4] ss:$8 sps:$4 sm:$0xff]   ;;  %v2091_v14 = vld [vmem:[%s2357_s27] ss:$8 sps:$4 sm:$0xff]   ;;  %v2244_v18 = vmov 0  }
  0x1d   : > { %v609_v3 = vld [vmem:[#allocation2] sm:$0xff]  ;;  %v610_v5 = vld [vmem:[#allocation2 + $0x8] sm:$0xff]  ;;  %v2092_v15 = vld [vmem:[%s2357_s27 + $0x14] ss:$8 sps:$4 sm:$0xff]   ;;  %696 = vmatprep.subr.bf16.mxu1 %v2089_v13  ;;  %728 = vmatprep.mubr.bf16.mxu1 %v2244_v18  ;;  %s2245_s21 = smov 96   ;;  %s2246_s24 = smov 64  }
  0x1e   : > { %v611_v4 = vld [vmem:[#allocation3] sm:$0xff]  ;;  %v612_v7 = vld [vmem:[#allocation3 + $0x8] sm:$0xff]  ;;  %697 = vmatpush1.bf16.msra.mxu1 %v2091_v14  ;;  %v2095_v17 = vld [vmem:[%s2357_s27 + $0x24] ss:$8 sps:$4 sm:$0xff]   ;;  %vm776_vm2 = vcmask 261120   ;;  %s2248_s29 = smov 16  }
  0x1f   : > { %v613_v6 = vadd.f32 %v611_v4, %v609_v3  ;;  %v614_v8 = vadd.f32 %v612_v7, %v610_v5  ;;  %v2094_v16 = vld [vmem:[%s2357_s27 + $0x10] ss:$8 sps:$4 sm:$0xff]   ;;  %698 = vmatprep.subr.bf16.mxu1 %v2092_v15  ;;  %v2097_v19 = vld [vmem:[%s2357_s27 + $0x20] ss:$8 sps:$4 sm:$0xff]   ;;  %v2098_v20 = vld [vmem:[%s2357_s27 + $0x34] ss:$8 sps:$4 sm:$0xff]  }
  0x20   : > { %v2100_v21 = vld [vmem:[%s2357_s27 + $0x30] ss:$8 sps:$4 sm:$0xff]   ;;  %v1909_v31 = vld [vmem:[%s593_s28] ss:$0 sm:$0xff]  ;;  %s2247_s27 = smov 32   ;;  %s2875_s28 = scalar_lea.vmem %s2858_s10, %s2347_s20  ;;  %vm936_vm3 = vcmask 130048  }
  0x21   : > { %v619_v9 = vmul.f32 %v613_v6, %v613_v6  ;;  %616 = vst.msk [vmem:[#allocation3] sm:$0xff] %vm615_vm1, %v613_v6  ;;  %v620_v10 = vmul.f32 %v614_v8, %v614_v8  ;;  %617 = vst.msk [vmem:[#allocation3 + $0x8] sm:$0xff] %vm615_vm1, %v614_v8  ;;  %s2876_s17 = sld [smem:[#allocation9_spill]]  ;;  %vm2251_vm4 = vmmov 0   ;;  %vm1358_vm5 = vcmask 523520   ;;  %p1957_p5 = scmp.ne.s32.totalorder %s2341_s19, 1 }
  0x22   : > { %699 = vmatpush1.bf16.msra.mxu1 %v2094_v16  ;;  %vm1369_vm6 = vcmask 785920   ;;  %vm1380_vm7 = vcmask 1048320  }
  0x23   : > { %v621_v11 = vsel %vm615_vm1, %v619_v9, 0.0  ;;  %v624_v12 = vsel %vm615_vm1, %v620_v10, 0.0  ;;  %700 = vmatprep.subr.bf16.mxu1 %v2095_v17 }
  0x24   : > { %622 = vadd.xlane.f32.xlu0 %v621_v11 }
  0x26   : > { %701 = vmatpush1.bf16.msra.mxu1 %v2097_v19 }
  0x27   : > { %702 = vmatprep.subr.bf16.mxu1 %v2098_v20 }
  0x28   : > { %625 = vadd.xlane.f32.xlu0 %v624_v12 }
  0x2a   : > { %703 = vmatpush1.bf16.msra.mxu1 %v2100_v21 }
  0xb1   : > { %v623_v22 = vpop.xlane.xlu0 %622 }
  0xb2   : > { %v628_v23 = vmul.f32 0.015625, %v623_v22 }
  0xb4   : > { %v630_v24 = vadd.f32 1e-06, %v628_v23 }
  0xb5   : > { %v626_v25 = vpop.xlane.xlu0 %625 }
  0xb6   : > { %2129 = vrsqrt.f32 %v630_v24  ;;  %v629_v26 = vmul.f32 0.015625, %v626_v25 }
  0xb8   : > { %v631_v27 = vadd.f32 1e-06, %v629_v26 }
  0xba   : > { %2131 = vrsqrt.f32 %v631_v27 }
  0xc0   : > { %v2130_v28 = vpop.eup %2129 }
  0xc1   : > { %v634_v29 = vmul.f32 %v2130_v28, %v613_v6 }
  0xc3   : > { %v642_v33 = vmul.f32 %v1909_v31, %v634_v29 }
  0xc4   : > { %v2132_v30 = vpop.eup %2131 }
  0xc5   : > { %v635_v32 = vmul.f32 %v2132_v30, %v614_v8 }
  0xc7   : > { %v643_v34 = vmul.f32 %v1909_v31, %v635_v32  ;;  %v2495_v31 = vld [vmem:[%s2875_s28] ss:$0 sm:$0xff] }
  0xc9   : > { %v644_v35 = vpack.c.bf16 %v643_v34, %v642_v33 }
  0xcb   : > { %1918 = vmatmul.mubr.msk.bf16.vlgmr.msra.gmra.mrb[0].mxu1 %vm615_vm1, %v644_v35 }
 0x19e   : > { %v2412_v36 = vpop.f32.mrb[0].mxu1 }
 0x19f   : > { %741 = vrot.lane.b32.xlu0 %v2412_v36, %s2245_s21  ;;  %v2416_v37 = vpop.f32.mrb[1].mxu1  ;;  %v768_v48 = vmul.f32 %v2412_v36, %v2412_v36 }
 0x1a0   : > { %761 = vrot.lane.b32.xlu1 %v2416_v37, %s2245_s21  ;;  %v2420_v38 = vpop.f32.mrb[2].mxu1  ;;  %v970_v43 = vmul.f32 %v2416_v37, %v2416_v37 }
 0x1a1   : > { %v2422_v39 = vpop.f32.mrb[3].mxu1  ;;  %v777_v52 = vsel %vm776_vm2, %v768_v48, 0.0  ;;  %v769_v57 = vmul.f32 %v2420_v38, %v2420_v38 }
 0x1a2   : > { %v1261_v40 = vpack.c.bf16 %v2422_v39, %v2416_v37  ;;  %v971_v41 = vmul.f32 %v2422_v39, %v2422_v39  ;;  %v974_v44 = vsel %vm776_vm2, %v970_v43, 0.0 }
 0x1a3   : > { %v780_v61 = vsel %vm776_vm2, %v769_v57, 0.0 }
 0x1a4   : > { %743 = vrot.lane.b32.xlu1 %v2420_v38, %s2245_s21  ;;  %v977_v42 = vsel %vm776_vm2, %v971_v41, 0.0 }
 0x1a8   : > { %763 = vrot.lane.b32.xlu1 %v2422_v39, %s2245_s21 }
 0x1ac   : > { %747 = vrot.lane.b32.xlu1 %v2412_v36, %s2246_s24 }
 0x1b0   : > { %749 = vrot.lane.b32.xlu1 %v2420_v38, %s2246_s24 }
 0x1b4   : > { %753 = vrot.lane.b32.xlu1 %v2412_v36, %s2247_s27 }
 0x1b8   : > { %755 = vrot.lane.b32.xlu1 %v2420_v38, %s2247_s27 }
 0x1be   : > { %978 = vadd.xlane.f32.xlu0 %v977_v42 }
 0x1dc   : > { %975 = vadd.xlane.f32.xlu1 %v974_v44 }
 0x211   : > { %v2451_v49 = vpop.permute.xlu0 %741 }
 0x212   : > { %v2444_v45 = vpop.permute.xlu1 %761  ;;  %v770_v51 = vmul.f32 %v2451_v49, %v2451_v49 }
 0x213   : > { %v972_v46 = vmul.f32 %v2444_v45, %v2444_v45 }
 0x214   : > { %v783_v56 = vsel %vm776_vm2, %v770_v51, 0.0 }
 0x215   : > { %v980_v47 = vsel %vm776_vm2, %v972_v46, 0.0 }
 0x216   : > { %v2453_v50 = vpop.permute.xlu1 %743  ;;  %981 = vadd.xlane.f32.xlu0 %v980_v47 }
 0x217   : > { %v771_v60 = vmul.f32 %v2453_v50, %v2453_v50 }
 0x219   : > { %v786_v1 = vsel %vm776_vm2, %v771_v60, 0.0 }
 0x21a   : > { %v2458_v53 = vpop.permute.xlu1 %763  ;;  %778 = vadd.xlane.f32.xlu0 %v777_v52 }
 0x21b   : > { %v973_v54 = vmul.f32 %v2458_v53, %v2458_v53 }
 0x21d   : > { %v983_v55 = vsel %vm776_vm2, %v973_v54, 0.0 }
 0x21e   : > { %984 = vadd.xlane.f32.xlu1 %v983_v55  ;;  %v2466_v58 = vpop.permute.xlu1 %747  ;;  %784 = vadd.xlane.f32.xlu0 %v783_v56 }
 0x21f   : > { %v772_v59 = vmul.f32 %v2466_v58, %v2466_v58 }
 0x221   : > { %v789_v62 = vsel %vm776_vm2, %v772_v59, 0.0 }
 0x222   : > { %781 = vadd.xlane.f32.xlu1 %v780_v61  ;;  %v2474_v63 = vpop.permute.xlu1 %749  ;;  %790 = vadd.xlane.f32.xlu0 %v789_v62 }
 0x223   : > { %v773_v0 = vmul.f32 %v2474_v63, %v2474_v63 }
 0x225   : > { %v792_v4 = vsel %vm776_vm2, %v773_v0, 0.0 }
 0x226   : > { %787 = vadd.xlane.f32.xlu1 %v786_v1  ;;  %v2479_v2 = vpop.permute.xlu1 %753 }
 0x227   : > { %v774_v3 = vmul.f32 %v2479_v2, %v2479_v2 }
 0x229   : > { %v795_v5 = vsel %vm776_vm2, %v774_v3, 0.0 }
 0x22a   : > { %793 = vadd.xlane.f32.xlu1 %v792_v4  ;;  %v2485_v6 = vpop.permute.xlu1 %755  ;;  %796 = vadd.xlane.f32.xlu0 %v795_v5 }
 0x22b   : > { %v775_v7 = vmul.f32 %v2485_v6, %v2485_v6 }
 0x22d   : > { %v798_v8 = vsel %vm776_vm2, %v775_v7, 0.0 }
 0x22e   : > { %799 = vadd.xlane.f32.xlu1 %v798_v8 }
 0x24b   : > { %v979_v9 = vpop.xlane.xlu0 %978 }
 0x24c   : > { %v987_v15 = vmul.f32 0.03125, %v979_v9 }
 0x24e   : > { %v991_v20 = vadd.f32 1e-06, %v987_v15 }
 0x269   : > { %v976_v10 = vpop.xlane.xlu1 %975 }
 0x26a   : > { %v986_v11 = vmul.f32 0.03125, %v976_v10 }
 0x26c   : > { %v990_v13 = vadd.f32 1e-06, %v986_v11 }
 0x26e   : > { %2133 = vrsqrt.f32 %v990_v13 }
 0x278   : > { %v2134_v28 = vpop.eup %2133 }
 0x279   : > { %v998_v42 = vmul.f32 %v2134_v28, %v2416_v37 }
 0x2a3   : > { %v982_v12 = vpop.xlane.xlu0 %981 }
 0x2a4   : > { %v988_v26 = vmul.f32 0.03125, %v982_v12 }
 0x2a6   : > { %v992_v33 = vadd.f32 1e-06, %v988_v26 }
 0x2a7   : > { %v779_v14 = vpop.xlane.xlu0 %778 }
 0x2a8   : > { %v802_v16 = vmul.f32 0.03125, %v779_v14 }
 0x2aa   : > { %v810_v17 = vadd.f32 1e-06, %v802_v16 }
 0x2ab   : > { %v985_v19 = vpop.xlane.xlu1 %984  ;;  %v785_v21 = vpop.xlane.xlu0 %784 }
 0x2ac   : > { %2135 = vrsqrt.f32 %v810_v17  ;;  %v804_v23 = vmul.f32 0.03125, %v785_v21  ;;  %v989_v44 = vmul.f32 0.03125, %v985_v19 }
 0x2ad   : > { %2137 = vrsqrt.f32 %v991_v20 }
 0x2ae   : > { %v812_v27 = vadd.f32 1e-06, %v804_v23  ;;  %v993_v54 = vadd.f32 1e-06, %v989_v44 }
 0x2af   : > { %v782_v22 = vpop.xlane.xlu1 %781  ;;  %v791_v35 = vpop.xlane.xlu0 %790 }
 0x2b0   : > { %v803_v24 = vmul.f32 0.03125, %v782_v22  ;;  %v806_v46 = vmul.f32 0.03125, %v791_v35 }
 0x2b2   : > { %v811_v25 = vadd.f32 1e-06, %v803_v24  ;;  %v814_v56 = vadd.f32 1e-06, %v806_v46 }
 0x2b3   : > { %v788_v29 = vpop.xlane.xlu1 %787 }
 0x2b4   : > { %2139 = vrsqrt.f32 %v811_v25  ;;  %v805_v34 = vmul.f32 0.03125, %v788_v29 }
 0x2b5   : > { %2141 = vrsqrt.f32 %v812_v27 }
 0x2b6   : > { %v2136_v30 = vpop.eup %2135  ;;  %2143 = vrsqrt.f32 %v992_v33  ;;  %v813_v47 = vadd.f32 1e-06, %v805_v34 }
 0x2b7   : > { %v826_v32 = vmul.f32 %v2136_v30, %v2412_v36  ;;  %v2138_v43 = vpop.eup %2137  ;;  %v1920_v36 = vld [vmem:[%s590_s25] ss:$0 sm:$0xff]  ;;  %v794_v57 = vpop.xlane.xlu1 %793  ;;  %s2249_s25 = smov 112  }
 0x2b8   : > { %v2509_v48 = vmul.f32 %v1920_v36, %v998_v42  ;;  %v999_v51 = vmul.f32 %v2138_v43, %v2422_v39  ;;  %2145 = vrsqrt.f32 %v813_v47  ;;  %v797_v59 = vpop.xlane.xlu0 %796  ;;  %v807_v1 = vmul.f32 0.03125, %v794_v57  ;;  %v1013_v57 = vld [vmem:[%s2852_s4 + $0x8] sm:$0xff] }
 0x2b9   : > { %v2499_v41 = vmul.f32 %v2495_v31, %v826_v32  ;;  %2147 = vrsqrt.f32 %v993_v54  ;;  %v1016_v54 = vld [vmem:[%s2853_s5] sm:$0xff] }
 0x2ba   : > { %v2519_v62 = vmul.f32 %v1920_v36, %v999_v51  ;;  %2149 = vrsqrt.f32 %v814_v56  ;;  %v1020_v3 = vsub.f32 0.0, %v2509_v48  ;;  %v815_v8 = vadd.f32 1e-06, %v807_v1  ;;  %v1012_v56 = vld [vmem:[%s2852_s4] sm:$0xff] }
 0x2bb   : > { %912 = vrot.lane.b32.xlu1 %v2499_v41, %s2248_s29  ;;  %v864_v61 = vsub.f32 0.0, %v2499_v41  ;;  %v800_v10 = vpop.xlane.xlu1 %799 }
 0x2bc   : > { %v1021_v4 = vsub.f32 0.0, %v2519_v62  ;;  %2151 = vrsqrt.f32 %v815_v8 }
 0x2be   : > { %v2140_v52 = vpop.eup %2139 }
 0x2bf   : > { %1044 = vrot.lane.b32.xlu1 %v2509_v48, %s2248_s29  ;;  %v827_v55 = vmul.f32 %v2140_v52, %v2420_v38  ;;  %v2142_v0 = vpop.eup %2141  ;;  %v808_v38 = vmul.f32 0.03125, %v797_v59  ;;  %v1017_v59 = vld [vmem:[%s2853_s5 + $0x8] sm:$0xff] }
 0x2c0   : > { %v828_v5 = vmul.f32 %v2142_v0, %v2451_v49  ;;  %v2144_v7 = vpop.eup %2143  ;;  %v809_v49 = vmul.f32 0.03125, %v800_v10  ;;  %v849_v10 = vld [vmem:[%s2850_s2 + $0x8] sm:$0xff] }
 0x2c1   : > { %v2516_v60 = vmul.f32 %v2495_v31, %v827_v55  ;;  %v816_v9 = vadd.f32 1e-06, %v808_v38  ;;  %v1000_v12 = vmul.f32 %v2144_v7, %v2444_v45  ;;  %v856_v38 = vld [vmem:[%s2851_s3] sm:$0xff]  ;;  %v1061_v7 = vmul.f32 %v1013_v57, %v2519_v62 }
 0x2c2   : > { %v2530_v11 = vmul.f32 %v2495_v31, %v828_v5  ;;  %v2146_v13 = vpop.eup %2145  ;;  %v817_v20 = vadd.f32 1e-06, %v809_v49  ;;  %v1060_v5 = vmul.f32 %v1012_v56, %v2509_v48 }
 0x2c3   : > { %914 = vrot.lane.b32.xlu0 %v2516_v60, %s2248_s29  ;;  %880 = vrot.lane.b32.xlu1 %v864_v61, %s2249_s25  ;;  %2153 = vrsqrt.f32 %v816_v9  ;;  %v2148_v14 = vpop.eup %2147  ;;  %v865_v15 = vsub.f32 0.0, %v2516_v60  ;;  %v2538_v16 = vmul.f32 %v1920_v36, %v1000_v12  ;;  %v829_v17 = vmul.f32 %v2146_v13, %v2453_v50  ;;  %v848_v9 = vld [vmem:[%s2850_s2] sm:$0xff]  ;;  %v857_v12 = vld [vmem:[%s2851_s3 + $0x8] sm:$0xff] }
 0x2c4   : > { %v2150_v19 = vpop.eup %2149  ;;  %v866_v22 = vsub.f32 0.0, %v2530_v11  ;;  %v1001_v23 = vmul.f32 %v2148_v14, %v2458_v53  ;;  %2155 = vrsqrt.f32 %v817_v20  ;;  %v946_v20 = vmul.f32 %v849_v10, %v2516_v60 }
 0x2c5   : > { %v2545_v21 = vmul.f32 %v2495_v31, %v829_v17  ;;  %v830_v24 = vmul.f32 %v2150_v19, %v2466_v58  ;;  %v1022_v26 = vsub.f32 0.0, %v2538_v16  ;;  %v945_v17 = vmul.f32 %v848_v9, %v2499_v41  ;;  %v858_v41 = vld [vmem:[%s2851_s3 + $0x10] sm:$0xff]  ;;  %v860_v9 = vld [vmem:[%s2851_s3 + $0x20] sm:$0xff] }
 0x2c6   : > { %v2152_v50 = vpop.eup %2151  ;;  %v2553_v25 = vmul.f32 %v1920_v36, %v1001_v23 }
 0x2c7   : > { %1028 = vrot.lane.b32.xlu0 %v1020_v3, %s2249_s25  ;;  %1030 = vrot.lane.b32.xlu1 %v1021_v4, %s2249_s25  ;;  %v2557_v27 = vmul.f32 %v2495_v31, %v830_v24  ;;  %v867_v58 = vsub.f32 0.0, %v2545_v21  ;;  %v831_v30 = vmul.f32 %v2152_v50, %v2474_v63 }
 0x2c8   : > { %v1023_v33 = vsub.f32 0.0, %v2553_v25 }
 0x2c9   : > { %v868_v29 = vsub.f32 0.0, %v2557_v27  ;;  %v2570_v34 = vmul.f32 %v2495_v31, %v831_v30 }
 0x2cb   : > { %1046 = vrot.lane.b32.xlu0 %v2519_v62, %s2248_s29  ;;  %916 = vrot.lane.b32.xlu1 %v2530_v11, %s2248_s29  ;;  %v869_v63 = vsub.f32 0.0, %v2570_v34 }
 0x2cd   : > { %v2154_v28 = vpop.eup %2153 }
 0x2ce   : > { %v832_v32 = vmul.f32 %v2154_v28, %v2479_v2  ;;  %v2156_v42 = vpop.eup %2155 }
 0x2cf   : > { %882 = vrot.lane.b32.xlu0 %v865_v15, %s2249_s25  ;;  %1048 = vrot.lane.b32.xlu1 %v2538_v16, %s2248_s29  ;;  %v833_v43 = vmul.f32 %v2156_v42, %v2485_v6  ;;  %v859_v42 = vld [vmem:[%s2851_s3 + $0x18] sm:$0xff] }
 0x2d0   : > { %v2573_v35 = vmul.f32 %v2495_v31, %v832_v32  ;;  %v850_v32 = vld [vmem:[%s2850_s2 + $0x10] sm:$0xff] }
 0x2d1   : > { %v2584_v44 = vmul.f32 %v2495_v31, %v833_v43 }
 0x2d2   : > { %v870_v2 = vsub.f32 0.0, %v2573_v35 }
 0x2d3   : > { %918 = vrot.lane.b32.xlu0 %v2545_v21, %s2248_s29  ;;  %884 = vrot.lane.b32.xlu1 %v866_v22, %s2249_s25  ;;  %v871_v46 = vsub.f32 0.0, %v2584_v44 }
 0x2d7   : > { %1050 = vrot.lane.b32.xlu0 %v2553_v25, %s2248_s29  ;;  %1032 = vrot.lane.b32.xlu1 %v1022_v26, %s2249_s25 }
 0x2db   : > { %886 = vrot.lane.b32.xlu0 %v867_v58, %s2249_s25  ;;  %888 = vrot.lane.b32.xlu1 %v868_v29, %s2249_s25 }
 0x2df   : > { %1034 = vrot.lane.b32.xlu0 %v1023_v33, %s2249_s25  ;;  %920 = vrot.lane.b32.xlu1 %v2557_v27, %s2248_s29  ;;  %v851_v33 = vld [vmem:[%s2850_s2 + $0x18] sm:$0xff] }
 0x2e3   : > { %890 = vrot.lane.b32.xlu0 %v869_v63, %s2249_s25  ;;  %892 = vrot.lane.b32.xlu1 %v870_v2, %s2249_s25 }
 0x2e7   : > { %922 = vrot.lane.b32.xlu0 %v2570_v34, %s2248_s29  ;;  %924 = vrot.lane.b32.xlu1 %v2573_v35, %s2248_s29 }
 0x2eb   : > { %894 = vrot.lane.b32.xlu0 %v871_v46, %s2249_s25  ;;  %v1018_v46 = vld [vmem:[%s2853_s5 + $0x10] sm:$0xff] }
 0x2ef   : > { %926 = vrot.lane.b32.xlu0 %v2584_v44, %s2248_s29 }
 0x32d   : > { %v913_v6 = vpop.permute.xlu1 %912 }
 0x331   : > { %v1045_v47 = vpop.permute.xlu1 %1044 }
 0x335   : > { %v881_v36 = vpop.permute.xlu1 %880  ;;  %v915_v51 = vpop.permute.xlu0 %914 }
 0x336   : > { %v937_v3 = vsel %vm936_vm3, %v881_v36, %v913_v6  ;;  %v947_v36 = vmul.f32 %v850_v32, %v2530_v11 }
 0x337   : > { %v953_v13 = vmul.f32 %v937_v3, %v856_v38 }
 0x339   : > { %v1031_v31 = vpop.permute.xlu1 %1030  ;;  %v1029_v52 = vpop.permute.xlu0 %1028  ;;  %v961_v23 = vadd.f32 %v953_v13, %v945_v17  ;;  %v852_v13 = vld [vmem:[%s2850_s2 + $0x20] sm:$0xff] }
 0x33a   : > { %v1056_v55 = vsel %vm936_vm3, %v1029_v52, %v1045_v47  ;;  %v1014_v52 = vld [vmem:[%s2852_s4 + $0x10] sm:$0xff] }
 0x33b   : > { %v1064_v61 = vmul.f32 %v1056_v55, %v1016_v54  ;;  %v1015_v54 = vld [vmem:[%s2852_s4 + $0x18] sm:$0xff] }
 0x33c   : > { %v1019_v55 = vld [vmem:[%s2853_s5 + $0x18] sm:$0xff]  ;;  %v1063_v38 = vmul.f32 %v1015_v54, %v2553_v25  ;;  %v861_v25 = vld [vmem:[%s2851_s3 + $0x28] sm:$0xff] }
 0x33d   : > { %v917_v0 = vpop.permute.xlu1 %916  ;;  %v1047_v1 = vpop.permute.xlu0 %1046  ;;  %v1068_v49 = vadd.f32 %v1064_v61, %v1060_v5 }
 0x33e   : > { %v1057_v4 = vsel %vm936_vm3, %v1031_v31, %v1047_v1 }
 0x33f   : > { %v1065_v8 = vmul.f32 %v1057_v4, %v1017_v59 }
 0x341   : > { %v1069_v14 = vadd.f32 %v1065_v8, %v1061_v7  ;;  %v1049_v15 = vpop.permute.xlu1 %1048  ;;  %v883_v48 = vpop.permute.xlu0 %882 }
 0x342   : > { %v938_v62 = vsel %vm936_vm3, %v883_v48, %v915_v51  ;;  %v948_v51 = vmul.f32 %v851_v33, %v2545_v21 }
 0x343   : > { %v1076_v19 = vpack.c.bf16 %v1069_v14, %v1068_v49  ;;  %v954_v22 = vmul.f32 %v938_v62, %v857_v12  ;;  %v949_v62 = vmul.f32 %v852_v13, %v2557_v27  ;;  %v855_v27 = vld [vmem:[%s2850_s2 + $0x38] sm:$0xff] }
 0x344   : > { %v952_v32 = vmul.f32 %v855_v27, %v2584_v44 }
 0x345   : > { %v962_v24 = vadd.f32 %v954_v22, %v946_v20  ;;  %v885_v50 = vpop.permute.xlu1 %884  ;;  %2061 = vmatprep.subr.msk.bf16.mxu1 %vm776_vm2, %v1076_v19  ;;  %v919_v26 = vpop.permute.xlu0 %918  ;;  %v1099_v28 = vsel %vm776_vm2, %v1076_v19, 0 }
 0x346   : > { %1998 = vmatpush3.bf16.xpose.msra.mxu1 %v1099_v28  ;;  %v939_v60 = vsel %vm936_vm3, %v885_v50, %v917_v0  ;;  %v1062_v0 = vmul.f32 %v1014_v52, %v2538_v16  ;;  %v853_v16 = vld [vmem:[%s2850_s2 + $0x28] sm:$0xff]  ;;  %v862_v50 = vld [vmem:[%s2851_s3 + $0x30] sm:$0xff] }
 0x347   : > { %v1072_v58 = vpack.c.bf16 %v962_v24, %v961_v23  ;;  %v955_v63 = vmul.f32 %v939_v60, %v858_v41  ;;  %v950_v19 = vmul.f32 %v853_v16, %v2570_v34  ;;  %v863_v34 = vld [vmem:[%s2851_s3 + $0x38] sm:$0xff] }
 0x349   : > { %v1033_v29 = vpop.permute.xlu1 %1032  ;;  %2001 = vmatprep.mubr.msk.bf16.mxu1 %vm776_vm2, %v1072_v58  ;;  %v1051_v30 = vpop.permute.xlu0 %1050  ;;  %v963_v56 = vadd.f32 %v955_v63, %v947_v36  ;;  %v854_v58 = vld [vmem:[%s2850_s2 + $0x30] sm:$0xff] }
 0x34a   : > { %v1058_v6 = vsel %vm936_vm3, %v1033_v29, %v1049_v15  ;;  %v951_v60 = vmul.f32 %v854_v58, %v2573_v35  ;;  %v1079_v35 = vld [vmem:[%s2849_s1 + $0x8] sm:$0xff] }
 0x34b   : > { %v1066_v57 = vmul.f32 %v1058_v6, %v1018_v46 }
 0x34d   : > { %v889_v2 = vpop.permute.xlu1 %888  ;;  %v887_v43 = vpop.permute.xlu0 %886  ;;  %v1070_v4 = vadd.f32 %v1066_v57, %v1062_v0  ;;  %v1083_v0 = vld [vmem:[%s2849_s1 + $0x28] sm:$0xff] }
 0x34e   : > { %v940_v47 = vsel %vm936_vm3, %v887_v43, %v919_v26  ;;  %v1078_v43 = vld [vmem:[%s2849_s1] sm:$0xff] }
 0x34f   : > { %v956_v31 = vmul.f32 %v940_v47, %v859_v42  ;;  %v1081_v47 = vld [vmem:[%s2849_s1 + $0x18] sm:$0xff] }
 0x351   : > { %v964_v59 = vadd.f32 %v956_v31, %v948_v51  ;;  %v921_v61 = vpop.permute.xlu1 %920  ;;  %v1035_v11 = vpop.permute.xlu0 %1034  ;;  %v1080_v51 = vld [vmem:[%s2849_s1 + $0x10] sm:$0xff] }
 0x352   : > { %v1059_v21 = vsel %vm936_vm3, %v1035_v11, %v1051_v30  ;;  %v941_v10 = vsel %vm936_vm3, %v889_v2, %v921_v61 }
 0x353   : > { %v1073_v1 = vpack.c.bf16 %v964_v59, %v963_v56  ;;  %v1067_v3 = vmul.f32 %v1059_v21, %v1019_v55  ;;  %v957_v49 = vmul.f32 %v941_v10, %v860_v9  ;;  %v1082_v59 = vld [vmem:[%s2849_s1 + $0x20] sm:$0xff] }
 0x355   : > { %v1071_v5 = vadd.f32 %v1067_v3, %v1063_v38  ;;  %v893_v7 = vpop.permute.xlu1 %892  ;;  %v891_v8 = vpop.permute.xlu0 %890  ;;  %v965_v22 = vadd.f32 %v957_v49, %v949_v62 }
 0x357   : > { %v1077_v12 = vpack.c.bf16 %v1071_v5, %v1070_v4  ;;  %v1084_v4 = vld [vmem:[%s2849_s1 + $0x30] sm:$0xff]  ;;  %v1085_v5 = vld [vmem:[%s2849_s1 + $0x38] sm:$0xff] }
 0x359   : > { %2062 = vmatprep.subr.msk.bf16.mxu1 %vm776_vm2, %v1077_v12  ;;  %v923_v14 = vpop.permute.xlu0 %922  ;;  %v1102_v15 = vsel %vm776_vm2, %v1077_v12, 0  ;;  %v925_v17 = vpop.permute.xlu1 %924 }
 0x35a   : > { %v942_v48 = vsel %vm936_vm3, %v891_v8, %v923_v14  ;;  %2000 = vmatpush3.bf16.xpose.msra.mxu1 %v1102_v15  ;;  %v943_v26 = vsel %vm936_vm3, %v893_v7, %v925_v17 }
 0x35b   : > { %v958_v20 = vmul.f32 %v942_v48, %v861_v25  ;;  %v959_v29 = vmul.f32 %v943_v26, %v862_v50 }
 0x35d   : > { %v966_v23 = vadd.f32 %v958_v20, %v950_v19  ;;  %v895_v24 = vpop.permute.xlu0 %894  ;;  %v967_v42 = vadd.f32 %v959_v29, %v951_v60 }
 0x35f   : > { %v1074_v28 = vpack.c.bf16 %v966_v23, %v965_v22 }
 0x361   : > { %2002 = vmatmul.mubr.msk.bf16.vlgmr.msra.gmra.mrb[4].mxu1 %vm776_vm2, %v1073_v1  ;;  %v927_v30 = vpop.permute.xlu0 %926 }
 0x362   : > { %v944_v41 = vsel %vm936_vm3, %v895_v24, %v927_v30  ;;  %2005 = vmatprep.mubr.msk.bf16.mxu1 %vm776_vm2, %v1074_v28 }
 0x363   : > { %v960_v33 = vmul.f32 %v944_v41, %v863_v34 }
 0x365   : > { %v968_v63 = vadd.f32 %v960_v33, %v952_v32 }
 0x367   : > { %v1075_v2 = vpack.c.bf16 %v968_v63, %v967_v42 }
 0x369   : > { %2006 = vmatmul.mubr.msk.bf16.gmra.mrb[8].mxu1 %vm776_vm2, %v1075_v2 }
 0x434   : > { %v2003_v46 = vpop.f32.mrb[4].mxu1 }
 0x435   : > { %v1138_v6 = vpop.f32.mrb[5].mxu1  ;;  %v1147_v56 = vadd.f32 %v2003_v46, %v1080_v51 }
 0x436   : > { %v1139_v44 = vadd.f32 %v1138_v6, %v1078_v43  ;;  %v2004_v36 = vpop.f32.mrb[6].mxu1 }
 0x437   : > { %v1141_v31 = vpop.f32.mrb[7].mxu1  ;;  %v1150_v52 = vadd.f32 %v2004_v36, %v1081_v47  ;;  %v1175_v3 = vsel %vm776_vm2, %v1147_v56, -inf }
 0x438   : > { %v1142_v54 = vadd.f32 %v1141_v31, %v1079_v35  ;;  %v1169_v55 = vsel %vm776_vm2, %v1139_v44, -inf }
 0x439   : > { %1170 = vmax.xlane.f32.xlu1 %v1169_v55  ;;  %v1178_v11 = vsel %vm776_vm2, %v1150_v52, -inf }
 0x43a   : > { %v1172_v57 = vsel %vm776_vm2, %v1142_v54, -inf }
 0x43b   : > { %1173 = vmax.xlane.f32.xlu0 %v1172_v57 }
 0x43c   : > { %v2007_v61 = vpop.f32.mrb[8].mxu1 }
 0x43d   : > { %1179 = vmax.xlane.f32.xlu1 %v1178_v11  ;;  %v1154_v21 = vpop.f32.mrb[9].mxu1  ;;  %v1163_v9 = vadd.f32 %v2007_v61, %v1084_v4 }
 0x43e   : > { %v1155_v1 = vadd.f32 %v1154_v21, %v1082_v59  ;;  %v2008_v38 = vpop.f32.mrb[10].mxu1  ;;  %v1262_v59 = vpack.c.bf16 %v2458_v53, %v2444_v45 }
 0x43f   : > { %1176 = vmax.xlane.f32.xlu0 %v1175_v3  ;;  %v1157_v7 = vpop.f32.mrb[11].mxu1  ;;  %v1166_v10 = vadd.f32 %v2008_v38, %v1085_v5  ;;  %v1187_v25 = vsel %vm776_vm2, %v1163_v9, -inf }
 0x440   : > { %v1158_v8 = vadd.f32 %v1157_v7, %v1083_v0  ;;  %v1181_v13 = vsel %vm776_vm2, %v1155_v1, -inf }
 0x441   : > { %v1190_v16 = vsel %vm776_vm2, %v1166_v10, -inf }
 0x442   : > { %v1184_v12 = vsel %vm776_vm2, %v1158_v8, -inf }
 0x443   : > { %1185 = vmax.xlane.f32.xlu1 %v1184_v12  ;;  %1182 = vmax.xlane.f32.xlu0 %v1181_v13 }
 0x447   : > { %1191 = vmax.xlane.f32.xlu1 %v1190_v16  ;;  %1188 = vmax.xlane.f32.xlu0 %v1187_v25 }
 0x4c6   : > { %v1171_v49 = vpop.xlane.xlu1 %1170 }
 0x4c7   : > { %v1193_v62 = vsub.f32 %v1139_v44, %v1171_v49 }
 0x4c8   : > { %v1174_v14 = vpop.xlane.xlu0 %1173 }
 0x4c9   : > { %v1194_v15 = vsub.f32 %v1142_v54, %v1174_v14  ;;  %v1201_v24 = vmul.f32 1.442695, %v1193_v62 }
 0x4ca   : > { %v1180_v48 = vpop.xlane.xlu1 %1179 }
 0x4cb   : > { %v1196_v17 = vsub.f32 %v1150_v52, %v1180_v48  ;;  %v1203_v19 = vmul.f32 1.442695, %v1194_v15 }
 0x4cc   : > { %v1177_v20 = vpop.xlane.xlu0 %1176 }
 0x4cd   : > { %v1207_v22 = vmul.f32 1.442695, %v1196_v17  ;;  %v1195_v23 = vsub.f32 %v1147_v56, %v1177_v20 }
 0x4cf   : > { %2157 = vpow2.f32 %v1207_v22  ;;  %v1205_v50 = vmul.f32 1.442695, %v1195_v23  ;;  %v2101_v22 = vld [vmem:[%s2876_s17] sm:$0xff]   ;;  %v2250_v23 = vmov 0.0  }
 0x4d0   : > { %2159 = vpow2.f32 %v1203_v19  ;;  %v1186_v26 = vpop.xlane.xlu1 %1185  ;;  %v1183_v28 = vpop.xlane.xlu0 %1182  ;;  %2021 = vmatprep.subr.bf16.mxu1 %v2250_v23  ;;  %2037 = vmatprep.mubr.msk.bf16.mxu1 %vm2251_vm4, %v2250_v23 }
 0x4d1   : > { %2161 = vpow2.f32 %v1205_v50  ;;  %v1198_v58 = vsub.f32 %v1158_v8, %v1186_v26  ;;  %v1197_v27 = vsub.f32 %v1155_v1, %v1183_v28  ;;  %2022 = vmatpush3.bf16.msra.mxu1 %v2101_v22  ;;  %v2103_v50 = vld [vmem:[%s2876_s17 + $0x10] sm:$0xff]   ;;  %v2104_v26 = vld [vmem:[%s2876_s17 + $0x18] sm:$0xff]   ;;  %v2125_v22 = vld [vmem:[%s2372_s22 + $0x20] sm:$0xff]  }
 0x4d2   : > { %2163 = vpow2.f32 %v1201_v24  ;;  %v2102_v24 = vld [vmem:[%s2876_s17 + $0x8] sm:$0xff]   ;;  %2023 = vmatprep.subr.bf16.mxu1 %v2250_v23 }
 0x4d3   : > { %v1211_v60 = vmul.f32 1.442695, %v1198_v58  ;;  %v1209_v42 = vmul.f32 1.442695, %v1197_v27  ;;  %v2106_v58 = vld [vmem:[%s2876_s17 + $0x28] sm:$0xff]  }
 0x4d4   : > { %v1192_v34 = vpop.xlane.xlu1 %1191  ;;  %v1189_v29 = vpop.xlane.xlu0 %1188 }
 0x4d5   : > { %v1200_v30 = vsub.f32 %v1166_v10, %v1192_v34  ;;  %v1199_v41 = vsub.f32 %v1163_v9, %v1189_v29  ;;  %2024 = vmatpush3.bf16.msra.mxu1 %v2102_v24  ;;  %v2126_v24 = vld [vmem:[%s2372_s22 + $0x28] sm:$0xff]  }
 0x4d6   : > { %2025 = vmatprep.subr.bf16.mxu1 %v2250_v23 }
 0x4d7   : > { %v1215_v32 = vmul.f32 1.442695, %v1200_v30  ;;  %v1213_v33 = vmul.f32 1.442695, %v1199_v41  ;;  %v2107_v30 = vld [vmem:[%s2876_s17 + $0x30] sm:$0xff]   ;;  %v2108_v41 = vld [vmem:[%s2876_s17 + $0x38] sm:$0xff]  }
 0x4d9   : > { %v2158_v63 = vpop.eup %2157  ;;  %2165 = vpow2.f32 %v1215_v32  ;;  %2026 = vmatpush3.bf16.msra.mxu1 %v2103_v50  ;;  %v2127_v50 = vld [vmem:[%s2372_s22 + $0x30] sm:$0xff]  }
 0x4da   : > { %v2160_v2 = vpop.eup %2159  ;;  %2167 = vpow2.f32 %v1213_v33  ;;  %v1226_v43 = vsel %vm776_vm2, %v2158_v63, 0.0  ;;  %2027 = vmatprep.subr.bf16.mxu1 %v2250_v23 }
 0x4db   : > { %v2162_v46 = vpop.eup %2161  ;;  %2169 = vpow2.f32 %v1211_v60  ;;  %1227 = vadd.xlane.f32.xlu1 %v1226_v43  ;;  %v1220_v35 = vsel %vm776_vm2, %v2160_v2, 0.0 }
 0x4dc   : > { %2171 = vpow2.f32 %v1209_v42  ;;  %v1223_v6 = vsel %vm776_vm2, %v2162_v46, 0.0  ;;  %v2164_v47 = vpop.eup %2163 }
 0x4dd   : > { %1224 = vadd.xlane.f32.xlu0 %v1223_v6  ;;  %v1217_v44 = vsel %vm776_vm2, %v2164_v47, 0.0  ;;  %2028 = vmatpush3.bf16.msra.mxu1 %v2104_v26  ;;  %v2128_v26 = vld [vmem:[%s2372_s22 + $0x38] sm:$0xff]  }
 0x4de   : > { %2029 = vmatprep.subr.bf16.mxu1 %v2250_v23 }
 0x4df   : > { %1221 = vadd.xlane.f32.xlu1 %v1220_v35 }
 0x4e1   : > { %1218 = vadd.xlane.f32.xlu0 %v1217_v44 }
 0x4e3   : > { %v2166_v36 = vpop.eup %2165 }
 0x4e4   : > { %v2168_v51 = vpop.eup %2167  ;;  %v1238_v31 = vsel %vm776_vm2, %v2166_v36, 0.0 }
 0x4e5   : > { %v2170_v52 = vpop.eup %2169  ;;  %1239 = vadd.xlane.f32.xlu1 %v1238_v31  ;;  %v1235_v54 = vsel %vm776_vm2, %v2168_v51, 0.0 }
 0x4e6   : > { %v2172_v55 = vpop.eup %2171  ;;  %1236 = vadd.xlane.f32.xlu0 %v1235_v54  ;;  %v1232_v56 = vsel %vm776_vm2, %v2170_v52, 0.0 }
 0x4e7   : > { %v1229_v57 = vsel %vm776_vm2, %v2172_v55, 0.0 }
 0x4e9   : > { %1233 = vadd.xlane.f32.xlu1 %v1232_v56 }
 0x4ea   : > { %1230 = vadd.xlane.f32.xlu0 %v1229_v57 }
 0x4fa   : > { %1267 = vrot.lane.b32.xlu1 %v1262_v59, %s2246_s24 }
 0x500   : > { %1265 = vrot.lane.b32.xlu0 %v1261_v40, %s2246_s24 }
 0x568   : > { %v1228_v61 = vpop.xlane.xlu1 %1227 }
 0x56a   : > { %v1225_v11 = vpop.xlane.xlu0 %1224 }
 0x56c   : > { %v1222_v21 = vpop.xlane.xlu1 %1221 }
 0x56d   : > { %2173 = vrcp.f32 %v1222_v21 }
 0x56e   : > { %v1219_v0 = vpop.xlane.xlu0 %1218 }
 0x56f   : > { %2175 = vrcp.f32 %v1219_v0 }
 0x570   : > { %2177 = vrcp.f32 %v1225_v11 }
 0x571   : > { %2179 = vrcp.f32 %v1228_v61 }
 0x572   : > { %v1240_v1 = vpop.xlane.xlu1 %1239 }
 0x573   : > { %v1237_v38 = vpop.xlane.xlu0 %1236  ;;  %2181 = vrcp.f32 %v1240_v1  ;;  %v2111_v1 = vld [vmem:[%s2367_s18 + $0x4] ss:$8 sps:$4 sm:$0xff]  }
 0x576   : > { %v1234_v3 = vpop.xlane.xlu1 %1233 }
 0x577   : > { %v2174_v45 = vpop.eup %2173  ;;  %2183 = vrcp.f32 %v1234_v3  ;;  %v1231_v53 = vpop.xlane.xlu0 %1230  ;;  %v2114_v3 = vld [vmem:[%s2367_s18 + $0x14] ss:$8 sps:$4 sm:$0xff]  }
 0x578   : > { %2185 = vrcp.f32 %v1231_v53  ;;  %v1250_v39 = vmul.f32 %v2174_v45, %v2160_v2  ;;  %v2112_v45 = vld [vmem:[%s2367_s18 + $0x10] ss:$8 sps:$4 sm:$0xff]   ;;  %v2117_v53 = vld [vmem:[%s2367_s18 + $0x24] ss:$8 sps:$4 sm:$0xff]  }
 0x579   : > { %v2176_v4 = vpop.eup %2175  ;;  %2187 = vrcp.f32 %v1237_v38  ;;  %v2109_v38 = vld [vmem:[%s2367_s18] ss:$8 sps:$4 sm:$0xff]  }
 0x57a   : > { %v1249_v37 = vmul.f32 %v2176_v4, %v2164_v47  ;;  %v2178_v40 = vpop.eup %2177  ;;  %v1268_v9 = vpop.permute.xlu1 %1267  ;;  %v2115_v4 = vld [vmem:[%s2367_s18 + $0x20] ss:$8 sps:$4 sm:$0xff]  }
 0x57b   : > { %v1266_v5 = vpop.permute.xlu0 %1265  ;;  %v2180_v8 = vpop.eup %2179  ;;  %v1251_v10 = vmul.f32 %v2178_v40, %v2162_v46 }
 0x57c   : > { %2009 = vmatprep.subr.bf16.mxu0 %v1266_v5  ;;  %v1257_v7 = vpack.c.bf16 %v1250_v39, %v1249_v37  ;;  %v1252_v13 = vmul.f32 %v2180_v8, %v2158_v63  ;;  %v2120_v37 = vld [vmem:[%s2367_s18 + $0x34] ss:$8 sps:$4 sm:$0xff]   ;;  %v2118_v39 = vld [vmem:[%s2367_s18 + $0x30] ss:$8 sps:$4 sm:$0xff]  }
 0x57d   : > { %2010 = vmatpush3.bf16.msra.mxu0 %v1266_v5  ;;  %v2182_v12 = vpop.eup %2181 }
 0x57e   : > { %2011 = vmatprep.subr.bf16.mxu0 %v1268_v9  ;;  %2013 = vmatprep.mubr.msk.bf16.mxu0 %vm776_vm2, %v1257_v7  ;;  %v1258_v49 = vpack.c.bf16 %v1252_v13, %v1251_v10  ;;  %v1256_v19 = vmul.f32 %v2182_v12, %v2166_v36 }
 0x581   : > { %v2184_v16 = vpop.eup %2183  ;;  %2012 = vmatpush3.bf16.msra.mxu0 %v1268_v9 }
 0x582   : > { %v2186_v25 = vpop.eup %2185  ;;  %v1254_v14 = vmul.f32 %v2184_v16, %v2170_v52  ;;  %v1403_v52 = vld [vmem:[#allocation3 + $0x8] sm:$0xff]  ;;  %1572 = vmatprep.subr.bf16.mxu0 %v2111_v1 }
 0x583   : > { %v2188_v15 = vpop.eup %2187  ;;  %v1253_v48 = vmul.f32 %v2186_v25, %v2172_v55  ;;  %v1937_v25 = vld [vmem:[%s596_s30] ss:$0 sm:$0xff] }
 0x584   : > { %2014 = vmatmul.mubr.msk.bf16.vlgmr.msra.gmra.mrb[0].mxu0 %vm776_vm2, %v1258_v49  ;;  %v1255_v17 = vmul.f32 %v2188_v15, %v2168_v51  ;;  %v1402_v51 = vld [vmem:[#allocation3] sm:$0xff] }
 0x585   : > { %v1259_v62 = vpack.c.bf16 %v1254_v14, %v1253_v48  ;;  %1573 = vmatpush1.bf16.msra.mxu0 %v2109_v38 }
 0x586   : > { %v1260_v20 = vpack.c.bf16 %v1256_v19, %v1255_v17  ;;  %1574 = vmatprep.subr.bf16.mxu0 %v2114_v3  ;;  %v2122_v17 = vld [vmem:[%s2372_s22 + $0x8] sm:$0xff]   ;;  %v2123_v19 = vld [vmem:[%s2372_s22 + $0x10] sm:$0xff]  }
 0x587   : > { %2017 = vmatprep.mubr.msk.bf16.mxu0 %vm776_vm2, %v1259_v62  ;;  %v2121_v62 = vld [vmem:[%s2372_s22] sm:$0xff]  }
 0x589   : > { %1575 = vmatpush1.bf16.msra.mxu0 %v2112_v45 }
 0x58a   : > { %1576 = vmatprep.subr.bf16.mxu0 %v2117_v53 }
 0x58c   : > { %2018 = vmatmul.mubr.msk.bf16.gmra.mrb[4].mxu0 %vm776_vm2, %v1260_v20  ;;  %v2124_v20 = vld [vmem:[%s2372_s22 + $0x18] sm:$0xff]   ;;  %s2877_s22 = sld [smem:[#allocation12_spill]] (!%p1957_p5) }
 0x58d   : > { %1604 = vmatprep.mubr.bf16.mxu0 %v2244_v18  ;;  %v2105_v18 = vld [vmem:[%s2876_s17 + $0x20] sm:$0xff]   ;;  %1577 = vmatpush1.bf16.msra.mxu0 %v2115_v4 }
 0x58e   : > { %2030 = vmatpush3.bf16.msra.mxu1 %v2105_v18  ;;  %1578 = vmatprep.subr.bf16.mxu0 %v2120_v37 }
 0x58f   : > { %2031 = vmatprep.subr.bf16.mxu1 %v2250_v23 }
 0x591   : > { %1579 = vmatpush1.bf16.msra.mxu0 %v2118_v39 }
 0x592   : > { %2032 = vmatpush3.bf16.msra.mxu1 %v2106_v58  ;;  %2041 = vmatprep.subr.bf16.mxu0 %v2250_v23  ;;  %v1958_v53 = vld [vmem:[%s2877_s22] ss:$0 sm:$0xff] (!%p1957_p5) }
 0x593   : > { %2033 = vmatprep.subr.bf16.mxu1 %v2250_v23 }
 0x596   : > { %2034 = vmatpush3.bf16.msra.mxu1 %v2107_v30 }
 0x597   : > { %2035 = vmatprep.subr.bf16.mxu1 %v2250_v23 }
 0x59a   : > { %2036 = vmatpush3.bf16.msra.mxu1 %v2108_v41 }
 0x657   : > { %v2015_v28 = vpop.f32.mrb[0].mxu0 }
 0x658   : > { %1352 = vrot.lane.b32.xlu1 %v2015_v28, %s2247_s27  ;;  %v1317_v27 = vpop.f32.mrb[1].mxu0 }
 0x659   : > { %1348 = vst.msk [vmem:[#allocation4] sm:$0xff] %vm776_vm2, %v1317_v27  ;;  %v2016_v34 = vpop.f32.mrb[2].mxu0 }
 0x65a   : > { %1354 = vrot.lane.b32.xlu0 %v2016_v34, %s2247_s27  ;;  %v1320_v29 = vpop.f32.mrb[3].mxu0 }
 0x65b   : > { %1349 = vst.msk [vmem:[#allocation4 + $0x8] sm:$0xff] %vm776_vm2, %v1320_v29 }
 0x65f   : > { %v2019_v60 = vpop.f32.mrb[4].mxu0 }
 0x660   : > { %v1333_v32 = vpop.f32.mrb[5].mxu0 }
 0x661   : > { %1363 = vrot.lane.b32.xlu1 %v1333_v32, %s2246_s24  ;;  %v2020_v33 = vpop.f32.mrb[6].mxu0 }
 0x662   : > { %v1336_v42 = vpop.f32.mrb[7].mxu0 }
 0x663   : > { %1365 = vrot.lane.b32.xlu0 %v1336_v42, %s2246_s24 }
 0x665   : > { %1374 = vrot.lane.b32.xlu1 %v2019_v60, %s2245_s21 }
 0x667   : > { %1376 = vrot.lane.b32.xlu0 %v2020_v33, %s2245_s21 }
 0x6ca   : > { %v1353_v63 = vpop.permute.xlu1 %1352 }
 0x6cb   : > { %1359 = vst.msk [vmem:[#allocation4] sm:$0xff] %vm1358_vm5, %v1353_v63 }
 0x6cc   : > { %v1355_v2 = vpop.permute.xlu0 %1354 }
 0x6cd   : > { %1360 = vst.msk [vmem:[#allocation4 + $0x8] sm:$0xff] %vm1358_vm5, %v1355_v2 }
 0x6d3   : > { %v1364_v43 = vpop.permute.xlu1 %1363 }
 0x6d4   : > { %1370 = vst.msk [vmem:[#allocation4] sm:$0xff] %vm1369_vm6, %v1364_v43 }
 0x6d5   : > { %v1366_v46 = vpop.permute.xlu0 %1365 }
 0x6d6   : > { %1371 = vst.msk [vmem:[#allocation4 + $0x8] sm:$0xff] %vm1369_vm6, %v1366_v46 }
 0x6d7   : > { %v1375_v6 = vpop.permute.xlu1 %1374 }
 0x6d8   : > { %1381 = vst.msk [vmem:[#allocation4] sm:$0xff] %vm1380_vm7, %v1375_v6 }
 0x6d9   : > { %v1377_v47 = vpop.permute.xlu0 %1376 }
 0x6da   : > { %1382 = vst.msk [vmem:[#allocation4 + $0x8] sm:$0xff] %vm1380_vm7, %v1377_v47 }
 0x6df   : > { %v1383_v35 = vld [vmem:[#allocation4] sm:$0xff] }
 0x6e1   : > { %v1384_v44 = vld [vmem:[#allocation4 + $0x8] sm:$0xff] }
 0x6e2   : > { %v1385_v36 = vpack.c.bf16 %v1384_v44, %v1383_v35 }
 0x6e4   : > { %2038 = vmatmul.mubr.bf16.vlgmr.msra.gmra.mrb[12].mxu1 %v1385_v36 }
 0x7b7   : > { %v1486_v31 = vpop.f32.mrb[12].mxu1 }
 0x7b8   : > { %v1487_v54 = vadd.f32 %v1486_v31, %v1402_v51  ;;  %v2039_v55 = vpop.f32.mrb[13].mxu1 }
 0x7b9   : > { %v1489_v56 = vpop.f32.mrb[14].mxu1 }
 0x7ba   : > { %1493 = vst.msk [vmem:[#allocation3] sm:$0xff] %vm615_vm1, %v1487_v54  ;;  %v1490_v57 = vadd.f32 %v1489_v56, %v1403_v52  ;;  %v2040_v59 = vpop.f32.mrb[15].mxu1  ;;  %v1496_v61 = vmul.f32 %v1487_v54, %v1487_v54 }
 0x7bc   : > { %1494 = vst.msk [vmem:[#allocation3 + $0x8] sm:$0xff] %vm615_vm1, %v1490_v57  ;;  %v1498_v11 = vsel %vm615_vm1, %v1496_v61, 0.0  ;;  %v1497_v21 = vmul.f32 %v1490_v57, %v1490_v57 }
 0x7bd   : > { %1499 = vadd.xlane.f32.xlu1 %v1498_v11 }
 0x7be   : > { %v1501_v0 = vsel %vm615_vm1, %v1497_v21, 0.0 }
 0x7bf   : > { %1502 = vadd.xlane.f32.xlu0 %v1501_v0 }
 0x7c1   : > { %v1745_v51 = vld [vmem:[#allocation3] sm:$0xff] (!%p1957_p5) }
 0x84a   : > { %v1500_v40 = vpop.xlane.xlu1 %1499 }
 0x84b   : > { %v1504_v5 = vmul.f32 0.015625, %v1500_v40 }
 0x84c   : > { %v1503_v7 = vpop.xlane.xlu0 %1502 }
 0x84d   : > { %v1506_v8 = vadd.f32 1e-06, %v1504_v5  ;;  %v1505_v9 = vmul.f32 0.015625, %v1503_v7 }
 0x84f   : > { %2189 = vrsqrt.f32 %v1506_v8  ;;  %v1507_v10 = vadd.f32 1e-06, %v1505_v9 }
 0x851   : > { %2191 = vrsqrt.f32 %v1507_v10 }
 0x859   : > { %v2190_v12 = vpop.eup %2189 }
 0x85a   : > { %v1510_v13 = vmul.f32 %v2190_v12, %v1487_v54  ;;  %v1746_v54 = vld [vmem:[#allocation3 + $0x8] sm:$0xff] (!%p1957_p5) }
 0x85b   : > { %v2192_v16 = vpop.eup %2191 }
 0x85c   : > { %v1511_v49 = vmul.f32 %v2192_v16, %v1490_v57  ;;  %v1518_v14 = vmul.f32 %v1937_v25, %v1510_v13 }
 0x85e   : > { %v1519_v15 = vmul.f32 %v1937_v25, %v1511_v49 }
 0x860   : > { %v1520_v48 = vpack.c.bf16 %v1519_v15, %v1518_v14 }
 0x862   : > { %1946 = vmatmul.mubr.msk.bf16.vlgmr.msra.gmra.mrb[8].mxu0 %vm615_vm1, %v1520_v48 }
 0x863   : > { %2057 = vmatprep.mubr.msk.bf16.mxu0 %vm2251_vm4, %v2250_v23  ;;  %2042 = vmatpush3.bf16.msra.mxu0 %v2121_v62 }
 0x864   : > { %2043 = vmatprep.subr.bf16.mxu0 %v2250_v23 }
 0x867   : > { %2044 = vmatpush3.bf16.msra.mxu0 %v2122_v17 }
 0x868   : > { %2045 = vmatprep.subr.bf16.mxu0 %v2250_v23 }
 0x86b   : > { %2046 = vmatpush3.bf16.msra.mxu0 %v2123_v19 }
 0x86c   : > { %2047 = vmatprep.subr.bf16.mxu0 %v2250_v23 }
 0x86f   : > { %2048 = vmatpush3.bf16.msra.mxu0 %v2124_v20 }
 0x870   : > { %2049 = vmatprep.subr.bf16.mxu0 %v2250_v23 }
 0x873   : > { %2050 = vmatpush3.bf16.msra.mxu0 %v2125_v22 }
 0x874   : > { %2051 = vmatprep.subr.bf16.mxu0 %v2250_v23 }
 0x877   : > { %2052 = vmatpush3.bf16.msra.mxu0 %v2126_v24 }
 0x878   : > { %2053 = vmatprep.subr.bf16.mxu0 %v2250_v23 }
 0x87b   : > { %2054 = vmatpush3.bf16.msra.mxu0 %v2127_v50 }
 0x87c   : > { %2055 = vmatprep.subr.bf16.mxu0 %v2250_v23 }
 0x87f   : > { %2056 = vmatpush3.bf16.msra.mxu0 %v2128_v26 }
 0x935   : > { %v1606_v18 = vpop.f32.mrb[8].mxu0 }
 0x936   : > { %v1947_v28 = vmul.f32 -1.442695, %v1606_v18  ;;  %v1608_v58 = vpop.f32.mrb[9].mxu0 }
 0x937   : > { %v1610_v27 = vpop.f32.mrb[10].mxu0 }
 0x938   : > { %2193 = vpow2.f32 %v1947_v28  ;;  %v1948_v34 = vmul.f32 -1.442695, %v1610_v27  ;;  %v1612_v29 = vpop.f32.mrb[11].mxu0 }
 0x93a   : > { %2195 = vpow2.f32 %v1948_v34 }
 0x942   : > { %v2194_v30 = vpop.eup %2193 }
 0x943   : > { %v1621_v41 = vadd.f32 1.0, %v2194_v30 }
 0x944   : > { %v2196_v60 = vpop.eup %2195 }
 0x945   : > { %2197 = vrcp.f32 %v1621_v41  ;;  %v1622_v32 = vadd.f32 1.0, %v2196_v60 }
 0x947   : > { %2199 = vrcp.f32 %v1622_v32 }
 0x94f   : > { %v2198_v33 = vpop.eup %2197 }
 0x950   : > { %v1627_v42 = vmul.f32 %v2198_v33, %v1606_v18 }
 0x951   : > { %v2200_v63 = vpop.eup %2199 }
 0x952   : > { %v1629_v23 = vmul.f32 %v1627_v42, %v1608_v58  ;;  %v1628_v2 = vmul.f32 %v2200_v63, %v1610_v27 }
 0x954   : > { %v1630_v43 = vmul.f32 %v1628_v2, %v1612_v29 }
 0x956   : > { %v1631_v46 = vpack.c.bf16 %v1630_v43, %v1629_v23 }
 0x958   : > { %2058 = vmatmul.mubr.bf16.vlgmr.msra.gmra.mrb[12].mxu0 %v1631_v46 }
 0xa28   : > { %1742 = sbr.rel (%p1957_p5) target bundleno = 2783 (0xadf), region = 88 }
 0xa2b   : > { %v1730_v6 = vpop.f32.mrb[12].mxu0 }
 0xa2c   : > { %1737 = vst.msk [vmem:[#allocation2] sm:$0xff] %vm615_vm1, %v1730_v6  ;;  %v2059_v47 = vpop.f32.mrb[13].mxu0 }
 0xa2d   : > { %v1733_v35 = vpop.f32.mrb[14].mxu0 }
 0xa2e   : > { %1738 = vst.msk [vmem:[#allocation2 + $0x8] sm:$0xff] %vm615_vm1, %v1733_v35  ;;  %v2060_v44 = vpop.f32.mrb[15].mxu0 }
 0xa33   : > { %v1743_v36 = vld [vmem:[#allocation2] sm:$0xff] }
 0xa34   : > { %v1747_v52 = vadd.f32 %v1745_v51, %v1743_v36 }
 0xa35   : > { %v1744_v31 = vld [vmem:[#allocation2 + $0x8] sm:$0xff] }
 0xa36   : > { %v1748_v55 = vadd.f32 %v1746_v54, %v1744_v31  ;;  %v1750_v56 = vmul.f32 %v1747_v52, %v1747_v52 }
 0xa38   : > { %v1751_v57 = vmul.f32 %v1748_v55, %v1748_v55  ;;  %v1752_v59 = vsel %vm615_vm1, %v1750_v56, 0.0 }
 0xa39   : > { %1753 = vadd.xlane.f32.xlu0 %v1752_v59 }
 0xa3a   : > { %v1755_v61 = vsel %vm615_vm1, %v1751_v57, 0.0 }
 0xa3d   : > { %1756 = vadd.xlane.f32.xlu0 %v1755_v61 }
 0xac6   : > { %v1754_v11 = vpop.xlane.xlu0 %1753 }
 0xac7   : > { %v1758_v21 = vmul.f32 0.015625, %v1754_v11 }
 0xac9   : > { %v1760_v0 = vadd.f32 1e-06, %v1758_v21 }
 0xaca   : > { %v1757_v1 = vpop.xlane.xlu0 %1756 }
 0xacb   : > { %2201 = vrsqrt.f32 %v1760_v0  ;;  %v1759_v38 = vmul.f32 0.015625, %v1757_v1 }
 0xacd   : > { %v1761_v3 = vadd.f32 1e-06, %v1759_v38 }
 0xacf   : > { %2203 = vrsqrt.f32 %v1761_v3 }
 0xad5   : > { %v2202_v45 = vpop.eup %2201 }
 0xad6   : > { %v1764_v4 = vmul.f32 %v2202_v45, %v1747_v52 }
 0xad8   : > { %v1772_v37 = vmul.f32 %v1958_v53, %v1764_v4 }
 0xad9   : > { %v2204_v39 = vpop.eup %2203 }
 0xada   : > { %1774 = vst.msk [vmem:[#allocation5] sm:$0xff] %vm615_vm1, %v1772_v37  ;;  %v1765_v40 = vmul.f32 %v2204_v39, %v1748_v55 }
 0xadc   : > { %v1773_v5 = vmul.f32 %v1958_v53, %v1765_v40 }
 0xade   : > { %1775 = vst.msk [vmem:[#allocation5 + $0x8] sm:$0xff] %vm615_vm1, %v1773_v5 }
 0xadf PF: > { %p2067_p6 = scmp.eq.s32.totalorder %s2341_s19, 1  ;;  %s2252_s24 = smov [#allocation5]  }
 0xae0   : > { %s1782_s27 = sshll.u32 %s2252_s24, 4  ;;  %s1783_s27 = int_to_ptr.vmem [resolvable:$true] %s1782_s27 }
 0xae1   : > { %s2205_s25 = scalar_lea.vmem %s1783_s27, 256  ;;  %p2212_p10 = scmp.lt.s32.totalorder %s1783_s27, %s1783_s27 }
 0xae2   : > { %p2206_p7 = scmp.ne.s32.totalorder %s1783_s27, %s2205_s25  ;;  %p2213_p11 = scmp.lt.s32.totalorder %s2205_s25, %s2205_s25 }
 0xae4   : > { %p2207_p8 = pnand %p2206_p7, %p2067_p6  ;;  %p2214_p12 = por %p2213_p11, %p2212_p10 }
 0xae6   : > { %p2208_p9 = pneg %p2207_p8 }
 0xae8   : > { %p2215_p13 = pnand %p2214_p12, %p2208_p9 }
 0xaea   : > { %2218 = shalt.err (!%p2215_p13)
}
 0xaeb   : > { %s2878_s6 = sld [smem:[#allocation13_spill]] }
 0xaf1   : > { %s2219_s7 = scalar_lea.hbm %s2878_s6, 256 }
 0xaf2   : > { %p2220_p0 = scmp.ne.s32.totalorder %s2878_s6, %s2219_s7  ;;  %p2225_p3 = scmp.lt.u32.totalorder %s2219_s7, %s2878_s6 }
 0xaf4   : > { %p2221_p1 = pnand %p2220_p0, %p2067_p6 }
 0xaf6   : > { %p2222_p2 = pneg %p2221_p1 }
 0xaf8   : > { %p2227_p4 = pnand %p2225_p3, %p2222_p2 }
 0xafa   : > { %2230 = shalt.err (!%p2227_p4)
}
 0xafb   : > { %s2253_s16 = smov 128   ;;  %s2254_s17 = smov 8  }
 0xafc   : > { %2064 = dma.vmem_to_hbm [thread:$0]  (%p2067_p6), %s1783_s27, 256, %s2878_s6, [#allocation6], %s2253_s16, %s2253_s16, %s2254_s17  }
 0xafd   : > { %2236 = dma.done.wait (%p2067_p6), [#allocation6], 256  }
 0xafe   : > { %2238 = vsyncadd (%p2067_p6), [#allocation6], 4294967040 }
 0xaff PF: > { %s2879_s20 = sld [smem:[#allocation8_spill]] }
 0xb05   : > { %s26_s18 = sadd.s32 1, %s2879_s20  }
 0xb06   : > { %p23_p5 = scmp.ge.s32.totalorder %s26_s18, 4  }
 0xb08   :  { %25 = sbr.rel (!%p23_p5) target bundleno = 6 (0x6), region = 136 }
 0xb0f   :  { %1798 = vsyncpa [#allocation6], 1 }
 0xb10   :  { %1800 = vsyncpa [#allocation6 + $0x1], 1 }

</bundles_post_ra>
